<compile_context>
chip_gen: v7x
topology: tpu7x:2x2x1
jax: 0.10.0
libtpu: 0.0.40
codegen_flags: <defaults>
</compile_context>

<pallas_src>
import math

import jax
import jax.numpy as jnp
from jax.experimental import pallas as pl
from jax.experimental.pallas import tpu as pltpu

# Logical layer widths of the autoencoder (encoder then decoder).
DIMS = [28 * 28, 128, 64, 12, 3, 12, 64, 128, 28 * 28]
N_LAYERS = len(DIMS) - 1  # 8 linear layers

# Kernel-side layer widths: wide ends stay at their natural 784, the tiny mid
# layers are padded to one 128-lane vreg width (lane-dense matmuls).
KDIMS = [DIMS[0]] + [128] * (N_LAYERS - 1) + [DIMS[-1]]

# Activation applied AFTER each linear layer:
#   encoder: ReLU, ReLU, ReLU, (none)   decoder: ReLU, ReLU, ReLU, Sigmoid
ACTIVATIONS = ["relu", "relu", "relu", "none", "relu", "relu", "relu", "sigmoid"]


def _round_up(x, m):
    return ((x + m - 1) // m) * m


def _tpu_budget():
    """(max batch tile, vmem_limit_bytes) for the current TPU generation."""
    try:
        vmem = int(pltpu.get_tpu_info().vmem_capacity_bytes)
    except Exception:  # unknown backend / interpret mode
        vmem = 64 * 1024 * 1024
    if vmem >= 96 * 1024 * 1024:          # v5e / v6e: 128 MiB VMEM per core
        return 2048, 96 * 1024 * 1024
    return 1024, 48 * 1024 * 1024          # v7x: 64 MiB VMEM per core


def autoencoder_kernel(x_ref, *refs):
    """Fused 8-layer MLP forward on one [TB, 784] batch tile."""
    out_ref = refs[-1]
    p = refs[:-1]  # w0, b0, w1, b1, ..., w7, b7

    # Layer 0 (784 -> 128): bf16 MXU path; cast the f32 input tile in VMEM.
    h = jnp.dot(x_ref[...].astype(jnp.bfloat16), p[0][...],
                preferred_element_type=jnp.float32) + p[1][...]
    h = jnp.maximum(h, 0.0)

    # Layers 1..6 (<=128 wide): full f32 for accuracy, negligible MXU cost.
    for i in range(1, N_LAYERS - 1):
        h = jnp.dot(h, p[2 * i][...],
                    preferred_element_type=jnp.float32) + p[2 * i + 1][...]
        if ACTIVATIONS[i] == "relu":
            h = jnp.maximum(h, 0.0)

    # Layer 7 (128 -> 784): bf16 MXU path + sigmoid, written straight to out.
    acc = jnp.dot(h.astype(jnp.bfloat16), p[2 * (N_LAYERS - 1)][...],
                  preferred_element_type=jnp.float32) + p[2 * N_LAYERS - 1][...]
    out_ref[...] = jax.nn.sigmoid(acc).astype(out_ref.dtype)


def init_params(key, dtype=jnp.float32):
    """PyTorch-style init: U(-1/sqrt(fan_in), 1/sqrt(fan_in)). Unpadded, f32."""
    params = []
    for i in range(N_LAYERS):
        fan_in, fan_out = DIMS[i], DIMS[i + 1]
        key, kw, kb = jax.random.split(key, 3)
        bound = 1.0 / math.sqrt(fan_in)
        w = jax.random.uniform(kw, (fan_in, fan_out), dtype, -bound, bound)
        b = jax.random.uniform(kb, (1, fan_out), dtype, -bound, bound)
        params.append((w, b))
    return params


def pack_params(params):
    """Kernel layout: big end layers bf16, tiny mid layers zero-padded to 128 f32."""
    packed = []
    for i, (w, b) in enumerate(params):
        kin, kout = KDIMS[i], KDIMS[i + 1]
        big = (i == 0) or (i == N_LAYERS - 1)
        w_dt = jnp.bfloat16 if big else jnp.float32
        w_p = jnp.zeros((kin, kout), w_dt)
        w_p = w_p.at[: w.shape[0], : w.shape[1]].set(w.astype(w_dt))
        b_p = jnp.zeros((1, kout), jnp.float32)
        b_p = b_p.at[:, : b.shape[1]].set(b.astype(jnp.float32))
        packed.extend([w_p, b_p])
    return packed


def autoencoder_forward(x, packed_params, *, tb_max=None, vmem_limit_bytes=None):
    """Batch-tiled fused forward. x: [B, 784] float. Returns [B, 784] in x.dtype."""
    B, F = x.shape
    assert F == DIMS[0]

    auto_tb, auto_vmem = _tpu_budget()
    tb_cap = tb_max if tb_max is not None else auto_tb
    vmem_limit = vmem_limit_bytes if vmem_limit_bytes is not None else auto_vmem

    # Batch tile: multiple of 8 (f32 sublane), capped by generation budget / B.
    tb = max(8, min(_round_up(tb_cap, 8), _round_up(B, 8)))
    b_pad = _round_up(B, tb)
    grid = (b_pad // tb,)

    # Only a cheap batch-row pad when needed; no feature pad, no dtype cast.
    x_in = x if b_pad == B else jnp.pad(x, ((0, b_pad - B), (0, 0)))

    # Activations tiled over batch; weights/biases resident (constant index_map
    # -> same block every grid step, fetched once and kept in VMEM).
    x_spec = pl.BlockSpec((tb, F), lambda i: (i, 0))
    out_spec = pl.BlockSpec((tb, DIMS[-1]), lambda i: (i, 0))
    param_specs = []
    for li in range(N_LAYERS):
        param_specs.append(
            pl.BlockSpec((KDIMS[li], KDIMS[li + 1]), lambda i: (0, 0)))
        param_specs.append(
            pl.BlockSpec((1, KDIMS[li + 1]), lambda i: (0, 0)))

    # Advisory cost estimate (fused 8-layer MLP, HBM-bound).
    flops = 2 * sum(KDIMS[i] * KDIMS[i + 1] for i in range(N_LAYERS)) * b_pad
    param_bytes = sum(int(p.size) * p.dtype.itemsize for p in packed_params)
    bytes_accessed = (b_pad * F + b_pad * DIMS[-1]) * x.dtype.itemsize + param_bytes
    transcendentals = b_pad * DIMS[-1]  # final sigmoid

    out = pl.pallas_call(
        autoencoder_kernel,
        out_shape=jax.ShapeDtypeStruct((b_pad, DIMS[-1]), x.dtype),
        grid=grid,
        in_specs=[x_spec] + param_specs,
        out_specs=out_spec,
        compiler_params=pltpu.CompilerParams(
            dimension_semantics=("parallel",),  # megacore-friendly; harmless elsewhere
            vmem_limit_bytes=vmem_limit,
        ),
        cost_estimate=pl.CostEstimate(
            flops=int(flops),
            transcendentals=int(transcendentals),
            bytes_accessed=int(bytes_accessed),
        ),
    )(x_in, *packed_params)

    return out if b_pad == B else out[:B]


def reference_forward(x, params):
    """Pure-JAX f32 reference for correctness checking."""
    h = x.astype(jnp.float32)
    for i, (w, b) in enumerate(params):
        h = h @ w + b
        if ACTIVATIONS[i] == "relu":
            h = jnp.maximum(h, 0.0)
        elif ACTIVATIONS[i] == "sigmoid":
            h = jax.nn.sigmoid(h)
    return h.astype(x.dtype)


if __name__ == "__main__":
    key = jax.random.PRNGKey(0)
    key_params, key_x = jax.random.split(key)

    params = init_params(key_params)   # f32, unpadded (reference layout)
    packed = pack_params(params)       # kernel layout (bf16 ends, padded f32 mids)

    # Small but non-trivial: batch=40 with tb_max=16 exercises batch padding
    # (40 -> 48) and a multi-step grid (3 tiles).
    batch = 40
    x = jax.random.uniform(key_x, (batch, 28 * 28), jnp.float32)

    ref = reference_forward(x, params)

    out = autoencoder_forward(x, packed, tb_max=16)
    out = jax.block_until_ready(out)
    assert out.shape == (batch, 28 * 28)
    assert out.dtype == x.dtype
    assert bool(jnp.all(jnp.isfinite(out)))
    # bf16 end-layer matmuls vs f32 reference -> loosened tolerance
    # (sigmoid output in [0,1]).
    assert jnp.allclose(out, ref, atol=3e-2, rtol=3e-2)

    # Also exercise the generation-dependent default tile path (single tile).
    out2 = jax.block_until_ready(autoencoder_forward(x, packed))
    assert out2.shape == (batch, 28 * 28)
    assert jnp.allclose(out2, ref, atol=3e-2, rtol=3e-2)

    print("KERNEL_OK")
</pallas_src>

<mosaic_0001>
module attributes {stable_mosaic.version = 11 : i64} {
  func.func @autoencoder_kernel(%arg0: i32, %arg1: memref<16x784xf32, #tpu.memory_space<vmem>>, %arg2: memref<784x128xbf16, #tpu.memory_space<vmem>>, %arg3: memref<1x128xf32, #tpu.memory_space<vmem>>, %arg4: memref<128x128xf32, #tpu.memory_space<vmem>>, %arg5: memref<1x128xf32, #tpu.memory_space<vmem>>, %arg6: memref<128x128xf32, #tpu.memory_space<vmem>>, %arg7: memref<1x128xf32, #tpu.memory_space<vmem>>, %arg8: memref<128x128xf32, #tpu.memory_space<vmem>>, %arg9: memref<1x128xf32, #tpu.memory_space<vmem>>, %arg10: memref<128x128xf32, #tpu.memory_space<vmem>>, %arg11: memref<1x128xf32, #tpu.memory_space<vmem>>, %arg12: memref<128x128xf32, #tpu.memory_space<vmem>>, %arg13: memref<1x128xf32, #tpu.memory_space<vmem>>, %arg14: memref<128x128xf32, #tpu.memory_space<vmem>>, %arg15: memref<1x128xf32, #tpu.memory_space<vmem>>, %arg16: memref<128x784xbf16, #tpu.memory_space<vmem>>, %arg17: memref<1x784xf32, #tpu.memory_space<vmem>>, %arg18: memref<16x784xf32, #tpu.memory_space<vmem>>) attributes {dimension_semantics = [#tpu.dimension_semantics<parallel>], iteration_bounds = array<i64: 3>, scalar_prefetch = 0 : i64, scratch_operands = 0 : i64, tpu.core_type = #tpu.core_type<tc>, window_params = [{transform_indices = @transform_0, window_bounds = array<i64: 16, 784>}, {pipeline_mode = #tpu.pipeline_mode<synchronous>, transform_indices = @transform_1, window_bounds = array<i64: 784, 128>}, {pipeline_mode = #tpu.pipeline_mode<synchronous>, transform_indices = @transform_2, window_bounds = array<i64: 1, 128>}, {pipeline_mode = #tpu.pipeline_mode<synchronous>, transform_indices = @transform_3, window_bounds = array<i64: 128, 128>}, {pipeline_mode = #tpu.pipeline_mode<synchronous>, transform_indices = @transform_4, window_bounds = array<i64: 1, 128>}, {pipeline_mode = #tpu.pipeline_mode<synchronous>, transform_indices = @transform_5, window_bounds = array<i64: 128, 128>}, {pipeline_mode = #tpu.pipeline_mode<synchronous>, transform_indices = @transform_6, window_bounds = array<i64: 1, 128>}, {pipeline_mode = #tpu.pipeline_mode<synchronous>, transform_indices = @transform_7, window_bounds = array<i64: 128, 128>}, {pipeline_mode = #tpu.pipeline_mode<synchronous>, transform_indices = @transform_8, window_bounds = array<i64: 1, 128>}, {pipeline_mode = #tpu.pipeline_mode<synchronous>, transform_indices = @transform_9, window_bounds = array<i64: 128, 128>}, {pipeline_mode = #tpu.pipeline_mode<synchronous>, transform_indices = @transform_10, window_bounds = array<i64: 1, 128>}, {pipeline_mode = #tpu.pipeline_mode<synchronous>, transform_indices = @transform_11, window_bounds = array<i64: 128, 128>}, {pipeline_mode = #tpu.pipeline_mode<synchronous>, transform_indices = @transform_12, window_bounds = array<i64: 1, 128>}, {pipeline_mode = #tpu.pipeline_mode<synchronous>, transform_indices = @transform_13, window_bounds = array<i64: 128, 128>}, {pipeline_mode = #tpu.pipeline_mode<synchronous>, transform_indices = @transform_14, window_bounds = array<i64: 1, 128>}, {pipeline_mode = #tpu.pipeline_mode<synchronous>, transform_indices = @transform_15, window_bounds = array<i64: 128, 784>}, {pipeline_mode = #tpu.pipeline_mode<synchronous>, transform_indices = @transform_16, window_bounds = array<i64: 1, 784>}, {transform_indices = @transform_17, window_bounds = array<i64: 16, 784>}]} {
    %c0 = arith.constant 0 : index
    %c0_0 = arith.constant 0 : index
    %0 = vector.load %arg1[%c0, %c0_0] : memref<16x784xf32, #tpu.memory_space<vmem>>, vector<16x784xf32>
    %1 = arith.truncf %0 : vector<16x784xf32> to vector<16x784xbf16>
    %c0_1 = arith.constant 0 : index
    %c0_2 = arith.constant 0 : index
    %2 = vector.load %arg2[%c0_1, %c0_2] : memref<784x128xbf16, #tpu.memory_space<vmem>>, vector<784x128xbf16>
    %cst = arith.constant dense<0.000000e+00> : vector<16x128xf32>
    %3 = tpu.matmul %1, %2, %cst {dimension_numbers = #tpu.dot_dimension_numbers<[1], [0], [0], [1], [0, 0, 1, 1], [], []>} : vector<16x784xbf16>, vector<784x128xbf16>, vector<16x128xf32> -> vector<16x128xf32>
    %c0_3 = arith.constant 0 : index
    %c0_4 = arith.constant 0 : index
    %4 = vector.load %arg3[%c0_3, %c0_4] : memref<1x128xf32, #tpu.memory_space<vmem>>, vector<1x128xf32>
    %5 = vector.broadcast %4 : vector<1x128xf32> to vector<16x128xf32>
    %6 = arith.addf %3, %5 : vector<16x128xf32>
    %cst_5 = arith.constant 0.000000e+00 : f32
    %7 = vector.broadcast %cst_5 : f32 to vector<16x128xf32>
    %8 = arith.maximumf %6, %7 : vector<16x128xf32>
    %c0_6 = arith.constant 0 : index
    %c0_7 = arith.constant 0 : index
    %9 = vector.load %arg4[%c0_6, %c0_7] : memref<128x128xf32, #tpu.memory_space<vmem>>, vector<128x128xf32>
    %cst_8 = arith.constant dense<0.000000e+00> : vector<16x128xf32>
    %10 = tpu.matmul %8, %9, %cst_8 {dimension_numbers = #tpu.dot_dimension_numbers<[1], [0], [0], [1], [0, 0, 1, 1], [], []>} : vector<16x128xf32>, vector<128x128xf32>, vector<16x128xf32> -> vector<16x128xf32>
    %c0_9 = arith.constant 0 : index
    %c0_10 = arith.constant 0 : index
    %11 = vector.load %arg5[%c0_9, %c0_10] : memref<1x128xf32, #tpu.memory_space<vmem>>, vector<1x128xf32>
    %12 = vector.broadcast %11 : vector<1x128xf32> to vector<16x128xf32>
    %13 = arith.addf %10, %12 : vector<16x128xf32>
    %cst_11 = arith.constant 0.000000e+00 : f32
    %14 = vector.broadcast %cst_11 : f32 to vector<16x128xf32>
    %15 = arith.maximumf %13, %14 : vector<16x128xf32>
    %c0_12 = arith.constant 0 : index
    %c0_13 = arith.constant 0 : index
    %16 = vector.load %arg6[%c0_12, %c0_13] : memref<128x128xf32, #tpu.memory_space<vmem>>, vector<128x128xf32>
    %cst_14 = arith.constant dense<0.000000e+00> : vector<16x128xf32>
    %17 = tpu.matmul %15, %16, %cst_14 {dimension_numbers = #tpu.dot_dimension_numbers<[1], [0], [0], [1], [0, 0, 1, 1], [], []>} : vector<16x128xf32>, vector<128x128xf32>, vector<16x128xf32> -> vector<16x128xf32>
    %c0_15 = arith.constant 0 : index
    %c0_16 = arith.constant 0 : index
    %18 = vector.load %arg7[%c0_15, %c0_16] : memref<1x128xf32, #tpu.memory_space<vmem>>, vector<1x128xf32>
    %19 = vector.broadcast %18 : vector<1x128xf32> to vector<16x128xf32>
    %20 = arith.addf %17, %19 : vector<16x128xf32>
    %cst_17 = arith.constant 0.000000e+00 : f32
    %21 = vector.broadcast %cst_17 : f32 to vector<16x128xf32>
    %22 = arith.maximumf %20, %21 : vector<16x128xf32>
    %c0_18 = arith.constant 0 : index
    %c0_19 = arith.constant 0 : index
    %23 = vector.load %arg8[%c0_18, %c0_19] : memref<128x128xf32, #tpu.memory_space<vmem>>, vector<128x128xf32>
    %cst_20 = arith.constant dense<0.000000e+00> : vector<16x128xf32>
    %24 = tpu.matmul %22, %23, %cst_20 {dimension_numbers = #tpu.dot_dimension_numbers<[1], [0], [0], [1], [0, 0, 1, 1], [], []>} : vector<16x128xf32>, vector<128x128xf32>, vector<16x128xf32> -> vector<16x128xf32>
    %c0_21 = arith.constant 0 : index
    %c0_22 = arith.constant 0 : index
    %25 = vector.load %arg9[%c0_21, %c0_22] : memref<1x128xf32, #tpu.memory_space<vmem>>, vector<1x128xf32>
    %26 = vector.broadcast %25 : vector<1x128xf32> to vector<16x128xf32>
    %27 = arith.addf %24, %26 : vector<16x128xf32>
    %c0_23 = arith.constant 0 : index
    %c0_24 = arith.constant 0 : index
    %28 = vector.load %arg10[%c0_23, %c0_24] : memref<128x128xf32, #tpu.memory_space<vmem>>, vector<128x128xf32>
    %cst_25 = arith.constant dense<0.000000e+00> : vector<16x128xf32>
    %29 = tpu.matmul %27, %28, %cst_25 {dimension_numbers = #tpu.dot_dimension_numbers<[1], [0], [0], [1], [0, 0, 1, 1], [], []>} : vector<16x128xf32>, vector<128x128xf32>, vector<16x128xf32> -> vector<16x128xf32>
    %c0_26 = arith.constant 0 : index
    %c0_27 = arith.constant 0 : index
    %30 = vector.load %arg11[%c0_26, %c0_27] : memref<1x128xf32, #tpu.memory_space<vmem>>, vector<1x128xf32>
    %31 = vector.broadcast %30 : vector<1x128xf32> to vector<16x128xf32>
    %32 = arith.addf %29, %31 : vector<16x128xf32>
    %cst_28 = arith.constant 0.000000e+00 : f32
    %33 = vector.broadcast %cst_28 : f32 to vector<16x128xf32>
    %34 = arith.maximumf %32, %33 : vector<16x128xf32>
    %c0_29 = arith.constant 0 : index
    %c0_30 = arith.constant 0 : index
    %35 = vector.load %arg12[%c0_29, %c0_30] : memref<128x128xf32, #tpu.memory_space<vmem>>, vector<128x128xf32>
    %cst_31 = arith.constant dense<0.000000e+00> : vector<16x128xf32>
    %36 = tpu.matmul %34, %35, %cst_31 {dimension_numbers = #tpu.dot_dimension_numbers<[1], [0], [0], [1], [0, 0, 1, 1], [], []>} : vector<16x128xf32>, vector<128x128xf32>, vector<16x128xf32> -> vector<16x128xf32>
    %c0_32 = arith.constant 0 : index
    %c0_33 = arith.constant 0 : index
    %37 = vector.load %arg13[%c0_32, %c0_33] : memref<1x128xf32, #tpu.memory_space<vmem>>, vector<1x128xf32>
    %38 = vector.broadcast %37 : vector<1x128xf32> to vector<16x128xf32>
    %39 = arith.addf %36, %38 : vector<16x128xf32>
    %cst_34 = arith.constant 0.000000e+00 : f32
    %40 = vector.broadcast %cst_34 : f32 to vector<16x128xf32>
    %41 = arith.maximumf %39, %40 : vector<16x128xf32>
    %c0_35 = arith.constant 0 : index
    %c0_36 = arith.constant 0 : index
    %42 = vector.load %arg14[%c0_35, %c0_36] : memref<128x128xf32, #tpu.memory_space<vmem>>, vector<128x128xf32>
    %cst_37 = arith.constant dense<0.000000e+00> : vector<16x128xf32>
    %43 = tpu.matmul %41, %42, %cst_37 {dimension_numbers = #tpu.dot_dimension_numbers<[1], [0], [0], [1], [0, 0, 1, 1], [], []>} : vector<16x128xf32>, vector<128x128xf32>, vector<16x128xf32> -> vector<16x128xf32>
    %c0_38 = arith.constant 0 : index
    %c0_39 = arith.constant 0 : index
    %44 = vector.load %arg15[%c0_38, %c0_39] : memref<1x128xf32, #tpu.memory_space<vmem>>, vector<1x128xf32>
    %45 = vector.broadcast %44 : vector<1x128xf32> to vector<16x128xf32>
    %46 = arith.addf %43, %45 : vector<16x128xf32>
    %cst_40 = arith.constant 0.000000e+00 : f32
    %47 = vector.broadcast %cst_40 : f32 to vector<16x128xf32>
    %48 = arith.maximumf %46, %47 : vector<16x128xf32>
    %49 = arith.truncf %48 : vector<16x128xf32> to vector<16x128xbf16>
    %c0_41 = arith.constant 0 : index
    %c0_42 = arith.constant 0 : index
    %50 = vector.load %arg16[%c0_41, %c0_42] : memref<128x784xbf16, #tpu.memory_space<vmem>>, vector<128x784xbf16>
    %cst_43 = arith.constant dense<0.000000e+00> : vector<16x784xf32>
    %51 = tpu.matmul %49, %50, %cst_43 {dimension_numbers = #tpu.dot_dimension_numbers<[1], [0], [0], [1], [0, 0, 1, 1], [], []>} : vector<16x128xbf16>, vector<128x784xbf16>, vector<16x784xf32> -> vector<16x784xf32>
    %c0_44 = arith.constant 0 : index
    %c0_45 = arith.constant 0 : index
    %52 = vector.load %arg17[%c0_44, %c0_45] : memref<1x784xf32, #tpu.memory_space<vmem>>, vector<1x784xf32>
    %53 = vector.broadcast %52 : vector<1x784xf32> to vector<16x784xf32>
    %54 = arith.addf %51, %53 : vector<16x784xf32>
    %55 = arith.negf %54 : vector<16x784xf32>
    %56 = math.exp %55 : vector<16x784xf32>
    %cst_46 = arith.constant 1.000000e+00 : f32
    %57 = vector.broadcast %cst_46 : f32 to vector<16x784xf32>
    %58 = arith.addf %57, %56 : vector<16x784xf32>
    %59 = arith.divf %57, %58 : vector<16x784xf32>
    %c0_47 = arith.constant 0 : index
    %c0_48 = arith.constant 0 : index
    %60 = vector.load %arg18[%c0_47, %c0_48] : memref<16x784xf32, #tpu.memory_space<vmem>>, vector<16x784xf32>
    tpu.vector_store %arg18[%c0_47, %c0_48], %59 {strides = array<i32>} : memref<16x784xf32, #tpu.memory_space<vmem>>, vector<16x784xf32>,
    return
  }
  func.func @transform_0(%arg0: i32) -> (i32, i32) {
    %c0_i32 = arith.constant 0 : i32
    %c0_i32_0 = arith.constant 0 : i32
    return %arg0, %c0_i32 : i32, i32
  }
  func.func @transform_1(%arg0: i32) -> (i32, i32) {
    %c0_i32 = arith.constant 0 : i32
    %c0_i32_0 = arith.constant 0 : i32
    %c0_i32_1 = arith.constant 0 : i32
    return %c0_i32, %c0_i32_0 : i32, i32
  }
  func.func @transform_2(%arg0: i32) -> (i32, i32) {
    %c0_i32 = arith.constant 0 : i32
    %c0_i32_0 = arith.constant 0 : i32
    %c0_i32_1 = arith.constant 0 : i32
    return %c0_i32, %c0_i32_0 : i32, i32
  }
  func.func @transform_3(%arg0: i32) -> (i32, i32) {
    %c0_i32 = arith.constant 0 : i32
    %c0_i32_0 = arith.constant 0 : i32
    %c0_i32_1 = arith.constant 0 : i32
    return %c0_i32, %c0_i32_0 : i32, i32
  }
  func.func @transform_4(%arg0: i32) -> (i32, i32) {
    %c0_i32 = arith.constant 0 : i32
    %c0_i32_0 = arith.constant 0 : i32
    %c0_i32_1 = arith.constant 0 : i32
    return %c0_i32, %c0_i32_0 : i32, i32
  }
  func.func @transform_5(%arg0: i32) -> (i32, i32) {
    %c0_i32 = arith.constant 0 : i32
    %c0_i32_0 = arith.constant 0 : i32
    %c0_i32_1 = arith.constant 0 : i32
    return %c0_i32, %c0_i32_0 : i32, i32
  }
  func.func @transform_6(%arg0: i32) -> (i32, i32) {
    %c0_i32 = arith.constant 0 : i32
    %c0_i32_0 = arith.constant 0 : i32
    %c0_i32_1 = arith.constant 0 : i32
    return %c0_i32, %c0_i32_0 : i32, i32
  }
  func.func @transform_7(%arg0: i32) -> (i32, i32) {
    %c0_i32 = arith.constant 0 : i32
    %c0_i32_0 = arith.constant 0 : i32
    %c0_i32_1 = arith.constant 0 : i32
    return %c0_i32, %c0_i32_0 : i32, i32
  }
  func.func @transform_8(%arg0: i32) -> (i32, i32) {
    %c0_i32 = arith.constant 0 : i32
    %c0_i32_0 = arith.constant 0 : i32
    %c0_i32_1 = arith.constant 0 : i32
    return %c0_i32, %c0_i32_0 : i32, i32
  }
  func.func @transform_9(%arg0: i32) -> (i32, i32) {
    %c0_i32 = arith.constant 0 : i32
    %c0_i32_0 = arith.constant 0 : i32
    %c0_i32_1 = arith.constant 0 : i32
    return %c0_i32, %c0_i32_0 : i32, i32
  }
  func.func @transform_10(%arg0: i32) -> (i32, i32) {
    %c0_i32 = arith.constant 0 : i32
    %c0_i32_0 = arith.constant 0 : i32
    %c0_i32_1 = arith.constant 0 : i32
    return %c0_i32, %c0_i32_0 : i32, i32
  }
  func.func @transform_11(%arg0: i32) -> (i32, i32) {
    %c0_i32 = arith.constant 0 : i32
    %c0_i32_0 = arith.constant 0 : i32
    %c0_i32_1 = arith.constant 0 : i32
    return %c0_i32, %c0_i32_0 : i32, i32
  }
  func.func @transform_12(%arg0: i32) -> (i32, i32) {
    %c0_i32 = arith.constant 0 : i32
    %c0_i32_0 = arith.constant 0 : i32
    %c0_i32_1 = arith.constant 0 : i32
    return %c0_i32, %c0_i32_0 : i32, i32
  }
  func.func @transform_13(%arg0: i32) -> (i32, i32) {
    %c0_i32 = arith.constant 0 : i32
    %c0_i32_0 = arith.constant 0 : i32
    %c0_i32_1 = arith.constant 0 : i32
    return %c0_i32, %c0_i32_0 : i32, i32
  }
  func.func @transform_14(%arg0: i32) -> (i32, i32) {
    %c0_i32 = arith.constant 0 : i32
    %c0_i32_0 = arith.constant 0 : i32
    %c0_i32_1 = arith.constant 0 : i32
    return %c0_i32, %c0_i32_0 : i32, i32
  }
  func.func @transform_15(%arg0: i32) -> (i32, i32) {
    %c0_i32 = arith.constant 0 : i32
    %c0_i32_0 = arith.constant 0 : i32
    %c0_i32_1 = arith.constant 0 : i32
    return %c0_i32, %c0_i32_0 : i32, i32
  }
  func.func @transform_16(%arg0: i32) -> (i32, i32) {
    %c0_i32 = arith.constant 0 : i32
    %c0_i32_0 = arith.constant 0 : i32
    %c0_i32_1 = arith.constant 0 : i32
    return %c0_i32, %c0_i32_0 : i32, i32
  }
  func.func @transform_17(%arg0: i32) -> (i32, i32) {
    %c0_i32 = arith.constant 0 : i32
    %c0_i32_0 = arith.constant 0 : i32
    return %arg0, %c0_i32 : i32, i32
  }
}

</mosaic_0001>

<bundles_post_ra>
// kernel: tpu_custom_call.1
= control target key start
LH: loop header
LB: loop body
LE: loop exit
PB: predicated region body
PF: predicated region fallthrough
CT: control target
= control target key end

     0   :  { %s4680_s0 = inlined_call_operand.vmem [shape: f32[48,784], index: 0, kind: input, shape index: {}]   ;;  %s4681_s1 = inlined_call_operand.vmem [shape: bf16[784,128], index: 1, kind: input, shape index: {}]   ;;  %s4682_s2 = inlined_call_operand.vmem [shape: f32[1,128], index: 2, kind: input, shape index: {}]   ;;  %s4683_s3 = inlined_call_operand.hbm [shape: f32[128,128], index: 3, kind: input, shape index: {}]   ;;  %s4684_s4 = inlined_call_operand.vmem [shape: f32[1,128], index: 4, kind: input, shape index: {}]   ;;  %s4685_s5 = inlined_call_operand.hbm [shape: f32[128,128], index: 5, kind: input, shape index: {}]   ;;  %s4686_s6 = inlined_call_operand.vmem [shape: f32[1,128], index: 6, kind: input, shape index: {}]   ;;  %s4687_s7 = inlined_call_operand.vmem [shape: f32[128,128], index: 7, kind: input, shape index: {}]   ;;  %s4688_s8 = inlined_call_operand.vmem [shape: f32[1,128], index: 8, kind: input, shape index: {}]   ;;  %s4689_s9 = inlined_call_operand.hbm [shape: f32[128,128], index: 9, kind: input, shape index: {}]   ;;  %s4690_s10 = inlined_call_operand.vmem [shape: f32[1,128], index: 10, kind: input, shape index: {}]   ;;  %s4691_s11 = inlined_call_operand.hbm [shape: f32[128,128], index: 11, kind: input, shape index: {}]   ;;  %s4692_s12 = inlined_call_operand.vmem [shape: f32[1,128], index: 12, kind: input, shape index: {}]   ;;  %s4693_s13 = inlined_call_operand.hbm [shape: f32[128,128], index: 13, kind: input, shape index: {}]   ;;  %s4694_s14 = inlined_call_operand.vmem [shape: f32[1,128], index: 14, kind: input, shape index: {}]   ;;  %s4695_s15 = inlined_call_operand.vmem [shape: bf16[128,784], index: 15, kind: input, shape index: {}]   ;;  %s4696_s16 = inlined_call_operand.vmem [shape: f32[1,784], index: 16, kind: input, shape index: {}]   ;;  %s4697_s17 = inlined_call_operand.hbm [shape: f32[48,784], index: 17, kind: output, shape index: {}]  }
   0x1   :  { %4713 = sst [smem:[#allocation24_spill]] %s4680_s0 }
   0x2   :  { %4714 = sst [smem:[#allocation25_spill]] %s4681_s1 }
   0x3   :  { %4715 = sst [smem:[#allocation26_spill]] %s4685_s5 }
   0x4   :  { %4716 = sst [smem:[#allocation27_spill]] %s4694_s14 }
   0x5   :  { %4717 = sst [smem:[#allocation28_spill]] %s4696_s16 }
   0x6   :  { %4718 = sst [smem:[#allocation29_spill]] %s4697_s17 }
   0x7   :  { %22 = vsyncpa [#allocation3], 0 }
   0x8   :  { %23 = vsyncpa [#allocation6], 0 }
   0x9   :  { %24 = vsyncpa [#allocation9], 0 }
   0xa   :  { %25 = vsyncpa [#allocation4], 0 }
   0xb   :  { %27 = vsyncpa [#allocation4 + $0x1], 0  ;;  %s3965_s24 = smov 0   ;;  %s3967_s25 = smov 0  }
   0xc   :  { %s3969_s26 = smov 0   ;;  %s3971_s27 = smov 0  }
   0xd LB: > { %4719 = sst [smem:[#allocation16_spill]] %s3848_s24  ;;  %s3986_s28 = sadd.s32 4294967295, %s3860_s27   ;;  %s3860_s27 = sphi %s3971_s27, %s4752_s27   ;;  %s3856_s26 = sphi %s3969_s26, %s4755_s26   ;;  %s3852_s25 = sphi %s3967_s25, %s4754_s25   ;;  %s3848_s24 = sphi %s3965_s24, %s4753_s24  }
   0xe   : > { %4720 = sst [smem:[#allocation17_spill]] %s3852_s25  ;;  %s2600_s29 = sadd.s32 4294967294, %s3860_s27  }
   0xf   : > { %4721 = sst [smem:[#allocation18_spill]] %s3856_s26  ;;  %s3990_s0 = sadd.s32 1, %s3860_s27  }
  0x10   : > { %4722 = sst [smem:[#allocation19_spill]] %s3860_s27  ;;  %s402_s30 = sadd.s32 1, %s3856_s26 }
  0x11   : > { %4723 = sst [smem:[#allocation20_spill]] %s3990_s0  ;;  %s399_s18 = ssub.s32 %s3860_s27, %s3990_s0 }
  0x12   : > { %p412_p0 = scmp.ne.s32.totalorder %s3856_s26, %s3852_s25  ;;  %p400_p1 = scmp.eq.s32.totalorder %s399_s18, 0 }
  0x13   : > { %p413_p2 = scmp.eq.s32.totalorder %s3986_s28, 2  ;;  %p418_p3 = scmp.ne.s32.totalorder %s3852_s25, %s3848_s24 }
  0x14   : > { %p419_p4 = scmp.eq.s32.totalorder %s2600_s29, 2  ;;  %p2601_p7 = scmp.ge.s32.totalorder %s3860_s27, 1 }
  0x15   : > { %s4001_s19 = scalar_select %p400_p1, %s3856_s26, %s402_s30  }
  0x16   : > { %p4003_p5 = por %p413_p2, %p412_p0  ;;  %p4007_p6 = por %p419_p4, %p418_p3 }
  0x17   : > { %4724 = sst [smem:[#allocation21_spill]] %s4001_s19  ;;  %p426_p8 = scmp.lt.s32.totalorder %s3860_s27, 4 }
  0x18   : > { %s4725_s1 = scalar_select %p4003_p5, 1, 0 }
  0x19   : > { %s4727_s20 = scalar_select %p4007_p6, 1, 0 }
  0x1a   : > { %4726 = sst [smem:[#allocation22_spill]] %s4725_s1  ;;  %p4706_p9 = scmp.eq.s32.totalorder %s3986_s28, 0 }
  0x1b   : > { %4728 = sst [smem:[#allocation23_spill]] %s4727_s20  ;;  %p4014_p10 = pnand %p2601_p7, %p426_p8 }
  0x1c   : > { %s3862_s22 = smov [#allocation5]   ;;  %s3863_s30 = smov [#allocation8]  }
  0x1d   : > { %s4729_s21 = scalar_select %p4014_p10, 1, 0 }
  0x1e   : > { %p3386_p11 = pneg %p4014_p10  ;;  %s460_s23 = sshll.u32 %s3862_s22, 4  ;;  %s4020_s23 = int_to_ptr.vmem [resolvable:$true] %s460_s23 }
  0x1f   : > { %s498_s18 = sshll.u32 %s3863_s30, 4  ;;  %s3864_s19 = smov [#allocation2]   ;;  %s4028_s18 = int_to_ptr.vmem [resolvable:$true] %s498_s18 }
  0x20   : > { %p4024_p12 = pnand %p4706_p9, %p3386_p11  ;;  %s4030_s26 = sshll.u32 %s3864_s19, 4  ;;  %s445_s26 = int_to_ptr.vmem [resolvable:$true] %s4030_s26 }
  0x21   : > { %s4731_s5 = sld [smem:[#allocation26_spill]] }
  0x22   : > { %p4040_p0 = pneg %p4024_p12 }
  0x27   : > { %s3646_s24 = scalar_lea.hbm %s4731_s5, 2048 }
  0x28   : > { %p3647_p13 = scmp.ne.s32.totalorder %s4731_s5, %s3646_s24  ;;  %p3653_p3 = scmp.lt.u32.totalorder %s3646_s24, %s4731_s5 }
  0x2a   : > { %p3649_p1 = pnand %p4040_p0, %p3647_p13 }
  0x2c   : > { %p3650_p2 = pneg %p3649_p1 }
  0x2e   : > { %p3655_p4 = pnand %p3653_p3, %p3650_p2 }
  0x30   : > { %3658 = shalt.err (!%p3655_p4)
}
  0x31   : > { %s3659_s27 = scalar_lea.vmem %s4020_s23, 2048  ;;  %p3667_p9 = scmp.lt.s32.totalorder %s4020_s23, %s4020_s23 }
  0x32   : > { %p3660_p7 = scmp.ne.s32.totalorder %s4020_s23, %s3659_s27  ;;  %p3668_p6 = scmp.lt.s32.totalorder %s3659_s27, %s3659_s27 }
  0x34   : > { %p3662_p8 = pnand %p3660_p7, %p4040_p0  ;;  %p3669_p13 = por %p3668_p6, %p3667_p9 }
  0x36   : > { %p3663_p11 = pneg %p3662_p8 }
  0x38   : > { %p3670_p1 = pnand %p3669_p13, %p3663_p11 }
  0x3a   : > { %3673 = shalt.err (!%p3670_p1)
}
  0x3b   : > { %s3865_s0 = smov 128   ;;  %s3866_s24 = smov 8  }
  0x3c   : > { %3392 = dma.hbm_to_vmem [thread:$0]  (!%p4024_p12), %s4731_s5, 2048, %s4020_s23, [#allocation6], %s3865_s0, %s3865_s0, %s3866_s24  }
  0x3d   : > { %s3674_s27 = scalar_lea.hbm %s4691_s11, 2048 }
  0x3e   : > { %p3675_p6 = scmp.ne.s32.totalorder %s4691_s11, %s3674_s27  ;;  %p3681_p3 = scmp.lt.u32.totalorder %s3674_s27, %s4691_s11 }
  0x40   : > { %p3677_p9 = pnand %p3675_p6, %p4040_p0 }
  0x42   : > { %p3678_p2 = pneg %p3677_p9 }
  0x44   : > { %p3683_p4 = pnand %p3681_p3, %p3678_p2 }
  0x46   : > { %3686 = shalt.err (!%p3683_p4)
}
  0x47   : > { %s3687_s23 = scalar_lea.vmem %s4028_s18, 2048  ;;  %p3695_p13 = scmp.lt.s32.totalorder %s4028_s18, %s4028_s18 }
  0x48   : > { %p3688_p7 = scmp.ne.s32.totalorder %s4028_s18, %s3687_s23  ;;  %p3696_p1 = scmp.lt.s32.totalorder %s3687_s23, %s3687_s23 }
  0x4a   : > { %p3690_p8 = pnand %p3688_p7, %p4040_p0  ;;  %p3697_p6 = por %p3696_p1, %p3695_p13 }
  0x4c   : > { %p3691_p11 = pneg %p3690_p8 }
  0x4e   : > { %p3698_p9 = pnand %p3697_p6, %p3691_p11 }
  0x50   : > { %3701 = shalt.err (!%p3698_p9)
}
  0x51   : > { %3398 = dma.hbm_to_vmem [thread:$0]  (!%p4024_p12), %s4691_s11, 2048, %s4028_s18, [#allocation9], %s3865_s0, %s3865_s0, %s3866_s24  }
  0x52   : > { %s3702_s20 = scalar_lea.hbm %s4683_s3, 2048 }
  0x53   : > { %p3703_p2 = scmp.ne.s32.totalorder %s4683_s3, %s3702_s20  ;;  %p3709_p7 = scmp.lt.u32.totalorder %s3702_s20, %s4683_s3 }
  0x55   : > { %p3705_p3 = pnand %p3703_p2, %p4040_p0 }
  0x57   : > { %p3706_p4 = pneg %p3705_p3 }
  0x59   : > { %p3711_p8 = pnand %p3709_p7, %p3706_p4 }
  0x5b   : > { %3714 = shalt.err (!%p3711_p8)
}
  0x5c   : > { %s3715_s23 = scalar_lea.vmem %s445_s26, 2048  ;;  %p3723_p6 = scmp.lt.s32.totalorder %s445_s26, %s445_s26 }
  0x5d   : > { %p3716_p11 = scmp.ne.s32.totalorder %s445_s26, %s3715_s23  ;;  %p3724_p9 = scmp.lt.s32.totalorder %s3715_s23, %s3715_s23 }
  0x5f   : > { %p3718_p13 = pnand %p3716_p11, %p4040_p0  ;;  %p3725_p5 = por %p3724_p9, %p3723_p6 }
  0x61   : > { %p3719_p1 = pneg %p3718_p13 }
  0x63   : > { %p3726_p10 = pnand %p3725_p5, %p3719_p1 }
  0x65   : > { %3729 = shalt.err (!%p3726_p10)
}
  0x66   : > { %3389 = dma.hbm_to_vmem [thread:$0]  (!%p4024_p12), %s4683_s3, 2048, %s445_s26, [#allocation3], %s3865_s0, %s3865_s0, %s3866_s24  }
  0x67   : > { %s3867_s16 = smov [#allocation7]   ;;  %s3868_s1 = smov [#allocation10]  }
  0x68   : > { %s482_s25 = sshll.u32 %s3867_s16, 4  ;;  %s514_s20 = sshll.u32 %s3868_s1, 4  ;;  %s483_s25 = int_to_ptr.vmem [resolvable:$true] %s482_s25  ;;  %s515_s20 = int_to_ptr.vmem [resolvable:$true] %s514_s20 }
  0x69   : > { %s3730_s19 = scalar_lea.hbm %s4689_s9, 2048 }
  0x6a   : > { %p3731_p5 = scmp.ne.s32.totalorder %s4689_s9, %s3730_s19  ;;  %p3737_p3 = scmp.lt.u32.totalorder %s3730_s19, %s4689_s9 }
  0x6c   : > { %p3733_p10 = pnand %p3731_p5, %p4040_p0 }
  0x6e   : > { %p3734_p2 = pneg %p3733_p10 }
  0x70   : > { %p3739_p4 = pnand %p3737_p3, %p3734_p2 }
  0x72   : > { %3742 = shalt.err (!%p3739_p4)
}
  0x73   : > { %s3743_s26 = scalar_lea.vmem %s483_s25, 2048  ;;  %p3751_p13 = scmp.lt.s32.totalorder %s483_s25, %s483_s25 }
  0x74   : > { %p3744_p7 = scmp.ne.s32.totalorder %s483_s25, %s3743_s26  ;;  %p3752_p1 = scmp.lt.s32.totalorder %s3743_s26, %s3743_s26 }
  0x76   : > { %p3746_p8 = pnand %p3744_p7, %p4040_p0  ;;  %p3753_p6 = por %p3752_p1, %p3751_p13 }
  0x78   : > { %p3747_p11 = pneg %p3746_p8 }
  0x7a   : > { %p3754_p9 = pnand %p3753_p6, %p3747_p11 }
  0x7c   : > { %3757 = shalt.err (!%p3754_p9)
}
  0x7d   : > { %3395 = dma.hbm_to_vmem [thread:$0]  (!%p4024_p12), %s4689_s9, 2048, %s483_s25, [#allocation6], %s3865_s0, %s3865_s0, %s3866_s24  }
  0x7e   : > { %s3758_s22 = scalar_lea.hbm %s4693_s13, 2048 }
  0x7f   : > { %p3759_p5 = scmp.ne.s32.totalorder %s4693_s13, %s3758_s22  ;;  %p3765_p3 = scmp.lt.u32.totalorder %s3758_s22, %s4693_s13 }
  0x81   : > { %p3761_p10 = pnand %p3759_p5, %p4040_p0 }
  0x83   : > { %p3762_p2 = pneg %p3761_p10 }
  0x85   : > { %p3767_p4 = pnand %p3765_p3, %p3762_p2 }
  0x87   : > { %3770 = shalt.err (!%p3767_p4)
}
  0x88   : > { %s3771_s18 = scalar_lea.vmem %s515_s20, 2048  ;;  %p3779_p13 = scmp.lt.s32.totalorder %s515_s20, %s515_s20 }
  0x89   : > { %p3772_p7 = scmp.ne.s32.totalorder %s515_s20, %s3771_s18  ;;  %p3780_p1 = scmp.lt.s32.totalorder %s3771_s18, %s3771_s18 }
  0x8b   : > { %p3774_p8 = pnand %p3772_p7, %p4040_p0  ;;  %p3781_p6 = por %p3780_p1, %p3779_p13 }
  0x8d   : > { %p3775_p11 = pneg %p3774_p8 }
  0x8f   : > { %p3782_p9 = pnand %p3781_p6, %p3775_p11 }
  0x91   : > { %3785 = shalt.err (!%p3782_p9)
}
  0x92   : > { %3401 = dma.hbm_to_vmem [thread:$0]  (!%p4024_p12), %s4693_s13, 2048, %s515_s20, [#allocation9], %s3865_s0, %s3865_s0, %s3866_s24  }
  0x93   : > { %p4733_p5 = scmp.ne.s32.totalorder %s4729_s21, 0 }
  0x94   : > { %p4734_p0 = scmp.eq.s32.totalorder (!%p4733_p5), %s3986_s28, 0 }
  0x95   : > { %549 = sbr.rel (%p4733_p5) target bundleno = 2056 (0x808), region = 88 }
  0x9c   : > { %3831 = dma.done.wait (%p4734_p0), [#allocation3], 2048   ;;  %p4735_p10 = pmov %p4734_p0 }
  0x9d   : > { %p4736_p2 = pmov %p4734_p0 }
  0x9e   : > { %3833 = vsyncadd (%p4735_p10), [#allocation3], 4294965248 }
  0x9f   : > { %3835 = dma.done.wait (%p4736_p2), [#allocation6], 4096   ;;  %p4737_p3 = pmov %p4734_p0 }
  0xa0   : > { %p4738_p4 = pmov %p4734_p0 }
  0xa1   : > { %3837 = vsyncadd (%p4737_p3), [#allocation6], 4294963200 }
  0xa2   : > { %3839 = dma.done.wait (%p4738_p4), [#allocation9], 4096   ;;  %p4739_p12 = pmov %p4734_p0 }
  0xa3   : > { %s4740_s29 = sld [smem:[#allocation25_spill]]  ;;  %s2614_s19 = sshll.u32 %s3986_s28, 1  ;;  %v3869_v43 = vmov 0.0   ;;  %vm3870_vm0 = vmmov 0   ;;  %vm1047_vm1 = vcmask 130048  }
  0xa4   : > { %3841 = vsyncadd (%p4739_p12), [#allocation9], 4294963200  ;;  %p619_p7 = scmp.lt.s32.totalorder %s2614_s19, 5  ;;  %s4741_s27 = sld [smem:[#allocation24_spill]] }
  0xa5   : > { %s4742_s25 = sld [smem:[#allocation27_spill]]  ;;  %s4744_s18 = sld [smem:[#allocation17_spill]] }
  0xa6   : > { %s4757_s19 = smov (!%p619_p7, %s2614_s19), 5  ;;  %s4745_s0 = sld [smem:[#allocation22_spill]] }
  0xa7   : > { %s3362_s21 = smul.u32 56, %s4757_s19  ;;  %s4746_s5 = sld [smem:[#allocation29_spill]] }
  0xa8   : > { %s3872_s1 = smov [#allocation11]  }
  0xa9   : > { %v3461_v0 = vld [vmem:[%s4740_s29 + $0x40] sm:$0xff]   ;;  %v3465_v4 = vld [vmem:[%s4740_s29 + $0x48] sm:$0xff]   ;;  %v3469_v8 = vld [vmem:[%s4740_s29 + $0x50] sm:$0xff]   ;;  %s3790_s22 = sshll.u32 %s3872_s1, 4  ;;  %s3791_s22 = int_to_ptr.vmem [resolvable:$false] %s3790_s22 }
  0xaa   : > { %v3462_v1 = vld [vmem:[%s4740_s29] sm:$0xff]   ;;  %2748 = vmatprep.subr.bf16.mxu0 %v3461_v0  ;;  %v3466_v5 = vld [vmem:[%s4740_s29 + $0x8] sm:$0xff]   ;;  %v3470_v9 = vld [vmem:[%s4740_s29 + $0x10] sm:$0xff]   ;;  %s4259_s23 = scalar_lea.vmem %s4741_s27, %s3362_s21  ;;  %s4743_s27 = sld [smem:[#allocation28_spill]] }
  0xab   : > { %v3463_v2 = vld [vmem:[%s4740_s29 + $0xc0] sm:$0xff]   ;;  %2749 = vmatpush3.bf16.msra.mxu0 %v3462_v1  ;;  %v3467_v6 = vld [vmem:[%s4740_s29 + $0xc8] sm:$0xff]   ;;  %v3471_v10 = vld [vmem:[%s4740_s29 + $0xd0] sm:$0xff]   ;;  %s3363_s21 = smul.u32 1792, %s3986_s28  ;;  %s3792_s19 = scalar_lea.vmem %s3791_s22, 3584 }
  0xac   : > { %v3464_v3 = vld [vmem:[%s4740_s29 + $0x80] sm:$0xff]   ;;  %2770 = vmatprep.subr.bf16.mxu1 %v3463_v2  ;;  %2750 = vmatprep.subr.bf16.mxu0 %v3465_v4  ;;  %v3468_v7 = vld [vmem:[%s4740_s29 + $0x88] sm:$0xff]   ;;  %v3472_v11 = vld [vmem:[%s4740_s29 + $0x90] sm:$0xff]   ;;  %p4747_p11 = scmp.ne.s32.totalorder %s4745_s0, 0 }
  0xad   : > { %2771 = vmatpush3.bf16.msra.mxu1 %v3464_v3  ;;  %v3473_v12 = vld [vmem:[%s4740_s29 + $0x58] sm:$0xff]   ;;  %v3477_v16 = vld [vmem:[%s4740_s29 + $0x60] sm:$0xff]   ;;  %v3481_v20 = vld [vmem:[%s4740_s29 + $0x68] sm:$0xff]   ;;  %s4629_s14 = scalar_lea.hbm %s4746_s5, %s3363_s21 }
  0xae   : > { %2772 = vmatprep.subr.bf16.mxu1 %v3467_v6  ;;  %v3474_v13 = vld [vmem:[%s4740_s29 + $0x18] sm:$0xff]   ;;  %v3478_v17 = vld [vmem:[%s4740_s29 + $0x20] sm:$0xff]   ;;  %v3482_v21 = vld [vmem:[%s4740_s29 + $0x28] sm:$0xff]  }
  0xaf   : > { %2751 = vmatpush3.bf16.msra.mxu0 %v3466_v5  ;;  %v3475_v14 = vld [vmem:[%s4740_s29 + $0xd8] sm:$0xff]   ;;  %v3479_v18 = vld [vmem:[%s4740_s29 + $0xe0] sm:$0xff]   ;;  %v3483_v22 = vld [vmem:[%s4740_s29 + $0xe8] sm:$0xff]  }
  0xb0   : > { %2752 = vmatprep.subr.bf16.mxu0 %v3469_v8  ;;  %v3476_v15 = vld [vmem:[%s4740_s29 + $0x98] sm:$0xff]   ;;  %v3480_v19 = vld [vmem:[%s4740_s29 + $0xa0] sm:$0xff]   ;;  %v3484_v23 = vld [vmem:[%s4740_s29 + $0xa8] sm:$0xff]  }
  0xb1   : > { %2773 = vmatpush3.bf16.msra.mxu1 %v3468_v7  ;;  %v3485_v24 = vld [vmem:[%s4740_s29 + $0x70] sm:$0xff]   ;;  %v3489_v28 = vld [vmem:[%s4740_s29 + $0x78] sm:$0xff]   ;;  %v628_v31 = vld [vmem:[%s4259_s23 + $0x8] sm:$0xff] }
  0xb2   : > { %2774 = vmatprep.subr.bf16.mxu1 %v3471_v10  ;;  %v3486_v25 = vld [vmem:[%s4740_s29 + $0x30] sm:$0xff]   ;;  %v3490_v29 = vld [vmem:[%s4740_s29 + $0x38] sm:$0xff]   ;;  %v635_v32 = vld [vmem:[%s4259_s23 + $0x40] sm:$0xff] }
  0xb3   : > { %2753 = vmatpush3.bf16.msra.mxu0 %v3470_v9  ;;  %v3487_v26 = vld [vmem:[%s4740_s29 + $0xf0] sm:$0xff]   ;;  %v3491_v30 = vld [vmem:[%s4740_s29 + $0xf8] sm:$0xff]   ;;  %v642_v33 = vpack.c.bf16 %v635_v32, %v628_v31  ;;  %v627_v35 = vld [vmem:[%s4259_s23] sm:$0xff] }
  0xb4   : > { %2754 = vmatprep.subr.bf16.mxu0 %v3473_v12  ;;  %v3488_v27 = vld [vmem:[%s4740_s29 + $0xb0] sm:$0xff]   ;;  %v3492_v34 = vld [vmem:[%s4740_s29 + $0xb8] sm:$0xff]   ;;  %v3493_v38 = vld [vmem:[%s4740_s29 + $0x140] sm:$0xff]  }
  0xb5   : > { %2775 = vmatpush3.bf16.msra.mxu1 %v3472_v11  ;;  %v634_v36 = vld [vmem:[%s4259_s23 + $0x38] sm:$0xff]  ;;  %1083 = vmatprep.mubr.bf16.mxu0 %v642_v33  ;;  %v637_v40 = vld [vmem:[%s4259_s23 + $0x50] sm:$0xff]  ;;  %v3494_v42 = vld [vmem:[%s4740_s29 + $0x100] sm:$0xff]  }
  0xb6   : > { %2776 = vmatprep.subr.bf16.mxu1 %v3475_v14  ;;  %v641_v37 = vpack.c.bf16 %v634_v36, %v627_v35  ;;  %v630_v39 = vld [vmem:[%s4259_s23 + $0x18] sm:$0xff]  ;;  %v629_v44 = vld [vmem:[%s4259_s23 + $0x10] sm:$0xff]  ;;  %v636_v45 = vld [vmem:[%s4259_s23 + $0x48] sm:$0xff] }
  0xb7   : > { %2755 = vmatpush3.bf16.msra.mxu0 %v3474_v13  ;;  %v644_v41 = vpack.c.bf16 %v637_v40, %v630_v39  ;;  %v643_v46 = vpack.c.bf16 %v636_v45, %v629_v44  ;;  %v3495_v47 = vld [vmem:[%s4740_s29 + $0x148] sm:$0xff]   ;;  %v3497_v49 = vld [vmem:[%s4740_s29 + $0x150] sm:$0xff]   ;;  %v3499_v51 = vld [vmem:[%s4740_s29 + $0x158] sm:$0xff]  }
  0xb8   : > { %2756 = vmatprep.subr.bf16.mxu0 %v3477_v16  ;;  %v3496_v48 = vld [vmem:[%s4740_s29 + $0x108] sm:$0xff]   ;;  %v3498_v50 = vld [vmem:[%s4740_s29 + $0x110] sm:$0xff]   ;;  %v3500_v52 = vld [vmem:[%s4740_s29 + $0x118] sm:$0xff]  }
  0xb9   : > { %2777 = vmatpush3.bf16.msra.mxu1 %v3476_v15  ;;  %1124 = vmatprep.mubr.bf16.mxu1 %v644_v41  ;;  %v3501_v53 = vld [vmem:[%s4740_s29 + $0x160] sm:$0xff]   ;;  %v3503_v55 = vld [vmem:[%s4740_s29 + $0x168] sm:$0xff]   ;;  %v3505_v59 = vld [vmem:[%s4740_s29 + $0x170] sm:$0xff]  }
  0xba   : > { %2778 = vmatprep.subr.bf16.mxu1 %v3479_v18  ;;  %v3502_v54 = vld [vmem:[%s4740_s29 + $0x120] sm:$0xff]   ;;  %v632_v57 = vld [vmem:[%s4259_s23 + $0x28] sm:$0xff]  ;;  %v633_v62 = vld [vmem:[%s4259_s23 + $0x30] sm:$0xff] }
  0xbb   : > { %2757 = vmatpush3.bf16.msra.mxu0 %v3478_v17  ;;  %v3509_v56 = vld [vmem:[%s4740_s29 + $0x180] sm:$0xff]   ;;  %v3504_v58 = vld [vmem:[%s4740_s29 + $0x128] sm:$0xff]   ;;  %v3506_v1 = vld [vmem:[%s4740_s29 + $0x130] sm:$0xff]  }
  0xbc   : > { %2758 = vmatprep.subr.bf16.mxu0 %v3481_v20  ;;  %v639_v60 = vld [vmem:[%s4259_s23 + $0x60] sm:$0xff]  ;;  %v640_v63 = vld [vmem:[%s4259_s23 + $0x68] sm:$0xff]  ;;  %v3507_v2 = vld [vmem:[%s4740_s29 + $0x178] sm:$0xff]  }
  0xbd   : > { %2779 = vmatpush3.bf16.msra.mxu1 %v3480_v19  ;;  %v646_v61 = vpack.c.bf16 %v639_v60, %v632_v57  ;;  %v647_v0 = vpack.c.bf16 %v640_v63, %v633_v62  ;;  %v3508_v3 = vld [vmem:[%s4740_s29 + $0x138] sm:$0xff]   ;;  %v631_v4 = vld [vmem:[%s4259_s23 + $0x20] sm:$0xff]  ;;  %v1218_v8 = vld [vmem:[#allocation2 + $0x8] sm:$0xff] }
  0xbe   : > { %2780 = vmatprep.subr.bf16.mxu1 %v3483_v22  ;;  %v638_v5 = vld [vmem:[%s4259_s23 + $0x58] sm:$0xff]  ;;  %v1217_v7 = vld [vmem:[#allocation2] sm:$0xff]  ;;  %v1219_v9 = vld [vmem:[#allocation2 + $0x10] sm:$0xff] }
  0xbf   : > { %2759 = vmatpush3.bf16.msra.mxu0 %v3482_v21  ;;  %v645_v6 = vpack.c.bf16 %v638_v5, %v631_v4  ;;  %v3169_v10 = vpack.c.bf16 %v1218_v8, %v1217_v7  ;;  %v1220_v11 = vld [vmem:[#allocation2 + $0x18] sm:$0xff]  ;;  %v1221_v13 = vld [vmem:[#allocation2 + $0x20] sm:$0xff]  ;;  %v1222_v14 = vld [vmem:[#allocation2 + $0x28] sm:$0xff] }
  0xc0   : > { %2760 = vmatprep.subr.bf16.mxu0 %v3485_v24  ;;  %v3173_v12 = vpack.c.bf16 %v1220_v11, %v1219_v9  ;;  %v3177_v15 = vpack.c.bf16 %v1222_v14, %v1221_v13  ;;  %v1223_v16 = vld [vmem:[#allocation2 + $0x30] sm:$0xff]  ;;  %v1224_v17 = vld [vmem:[#allocation2 + $0x38] sm:$0xff]  ;;  %v1225_v19 = vld [vmem:[#allocation2 + $0x40] sm:$0xff] }
  0xc1   : > { %2781 = vmatpush3.bf16.msra.mxu1 %v3484_v23  ;;  %v3181_v18 = vpack.c.bf16 %v1224_v17, %v1223_v16  ;;  %v1226_v20 = vld [vmem:[#allocation2 + $0x48] sm:$0xff]  ;;  %v1227_v22 = vld [vmem:[#allocation2 + $0x50] sm:$0xff]  ;;  %v1228_v23 = vld [vmem:[#allocation2 + $0x58] sm:$0xff] }
  0xc2   : > { %2782 = vmatprep.subr.bf16.mxu1 %v3487_v26  ;;  %v3185_v21 = vpack.c.bf16 %v1226_v20, %v1225_v19  ;;  %v3189_v24 = vpack.c.bf16 %v1228_v23, %v1227_v22  ;;  %v1230_v26 = vld [vmem:[#allocation2 + $0x68] sm:$0xff]  ;;  %v1317_v31 = vld [vmem:[#allocation5] sm:$0xff]  ;;  %v1319_v33 = vld [vmem:[#allocation5 + $0x10] sm:$0xff] }
  0xc3   : > { %2761 = vmatpush3.bf16.msra.mxu0 %v3486_v25  ;;  %v1229_v25 = vld [vmem:[#allocation2 + $0x60] sm:$0xff]  ;;  %v1318_v32 = vld [vmem:[#allocation5 + $0x8] sm:$0xff]  ;;  %v1320_v35 = vld [vmem:[#allocation5 + $0x18] sm:$0xff] }
  0xc4   : > { %2762 = vmatprep.subr.bf16.mxu0 %v3489_v28  ;;  %v1231_v28 = vld [vmem:[#allocation2 + $0x70] sm:$0xff]  ;;  %v3205_v36 = vpack.c.bf16 %v1320_v35, %v1319_v33  ;;  %v1324_v41 = vld [vmem:[#allocation5 + $0x38] sm:$0xff]  ;;  %v1325_v44 = vld [vmem:[#allocation5 + $0x40] sm:$0xff] }
  0xc5   : > { %2783 = vmatpush3.bf16.msra.mxu1 %v3488_v27  ;;  %v3193_v27 = vpack.c.bf16 %v1230_v26, %v1229_v25  ;;  %v1323_v40 = vld [vmem:[#allocation5 + $0x30] sm:$0xff]  ;;  %v1326_v45 = vld [vmem:[#allocation5 + $0x48] sm:$0xff]  ;;  %v1332_v23 = vld [vmem:[#allocation5 + $0x78] sm:$0xff] }
  0xc6   : > { %2784 = vmatprep.subr.bf16.mxu1 %v3491_v30  ;;  %v1331_v22 = vld [vmem:[#allocation5 + $0x70] sm:$0xff]  ;;  %v1417_v25 = vld [vmem:[%s4687_s7] sm:$0xff]  ;;  %v1418_v26 = vld [vmem:[%s4687_s7 + $0x8] sm:$0xff] }
  0xc7   : > { %2763 = vmatpush3.bf16.msra.mxu0 %v3490_v29  ;;  %v1232_v29 = vld [vmem:[#allocation2 + $0x78] sm:$0xff] }
  0xc8   : > { %2792 = vmatprep.subr.bf16.mxu0 %v3493_v38  ;;  %v3197_v30 = vpack.c.bf16 %v1232_v29, %v1231_v28  ;;  %v1322_v38 = vld [vmem:[#allocation5 + $0x28] sm:$0xff]  ;;  %v3233_v28 = vpack.c.bf16 %v1418_v26, %v1417_v25  ;;  %v1420_v29 = vld [vmem:[%s4687_s7 + $0x18] sm:$0xff]  ;;  %v1617_v26 = vld [vmem:[#allocation8 + $0x10] sm:$0xff] }
  0xc9   : > { %2785 = vmatpush3.bf16.msra.mxu1 %v3492_v34  ;;  %v3201_v34 = vpack.c.bf16 %v1318_v32, %v1317_v31  ;;  %v1421_v31 = vld [vmem:[%s4687_s7 + $0x20] sm:$0xff]  ;;  %v1422_v32 = vld [vmem:[%s4687_s7 + $0x28] sm:$0xff]  ;;  %v1424_v35 = vld [vmem:[%s4687_s7 + $0x38] sm:$0xff] }
  0xca   : > { %2933 = vmatprep.subr.bf16.mxu1 %v3869_v43  ;;  %1084 = vmatmul.mubr.bf16.vlgmr.msra.gmra.mrb[0].mxu0 %v641_v37  ;;  %v1321_v37 = vld [vmem:[#allocation5 + $0x20] sm:$0xff]  ;;  %v3241_v33 = vpack.c.bf16 %v1422_v32, %v1421_v31  ;;  %v1616_v25 = vld [vmem:[#allocation8 + $0x8] sm:$0xff] }
  0xcb   : > { %2793 = vmatpush3.bf16.msra.mxu0 %v3494_v42  ;;  %1165 = vmatprep.mubr.bf16.mxu0 %v646_v61  ;;  %v3209_v39 = vpack.c.bf16 %v1322_v38, %v1321_v37  ;;  %v3213_v42 = vpack.c.bf16 %v1324_v41, %v1323_v40  ;;  %v1425_v37 = vld [vmem:[%s4687_s7 + $0x40] sm:$0xff]  ;;  %v1426_v38 = vld [vmem:[%s4687_s7 + $0x48] sm:$0xff]  ;;  %v1427_v40 = vld [vmem:[%s4687_s7 + $0x50] sm:$0xff] }
  0xcc   : > { %1125 = vmatmul.mubr.bf16.vlgmr.msra.gmra.mrb[0].mxu1 %v643_v46  ;;  %2794 = vmatprep.subr.bf16.mxu0 %v3495_v47  ;;  %v3217_v46 = vpack.c.bf16 %v1326_v45, %v1325_v44  ;;  %v1327_v47 = vld [vmem:[#allocation5 + $0x50] sm:$0xff]  ;;  %v1428_v41 = vld [vmem:[%s4687_s7 + $0x58] sm:$0xff]  ;;  %v1429_v44 = vld [vmem:[%s4687_s7 + $0x60] sm:$0xff] }
  0xcd   : > { %2935 = vmatprep.mubr.msk.bf16.mxu1 %vm3870_vm0, %v3869_v43  ;;  %2934 = vmatpush3.bf16.msra.mxu1 %v3509_v56  ;;  %v1430_v45 = vld [vmem:[%s4687_s7 + $0x68] sm:$0xff] }
  0xce   : > { %3170 = vmatprep.subr.bf16.mxu1 %v3169_v10  ;;  %v1620_v31 = vld [vmem:[#allocation8 + $0x28] sm:$0xff] }
  0xcf   : > { %2795 = vmatpush3.bf16.msra.mxu0 %v3496_v48  ;;  %v1328_v48 = vld [vmem:[#allocation5 + $0x58] sm:$0xff] }
  0xd0   : > { %2796 = vmatprep.subr.bf16.mxu0 %v3497_v49  ;;  %v3221_v49 = vpack.c.bf16 %v1328_v48, %v1327_v47  ;;  %v2667_v47 = vld [vmem:[%s4684_s4] ss:$0 sm:$0xff] }
  0xd3   : > { %2797 = vmatpush3.bf16.msra.mxu0 %v3498_v50  ;;  %v1329_v50 = vld [vmem:[#allocation5 + $0x60] sm:$0xff] }
  0xd4   : > { %2798 = vmatprep.subr.bf16.mxu0 %v3499_v51  ;;  %2936 = vmatmul.mubr.msk.bf16.vlgmr.msra.gmra.mrb[4].mxu1 %vm1047_vm1, %v647_v0  ;;  %v1330_v51 = vld [vmem:[#allocation5 + $0x68] sm:$0xff] }
  0xd5   : > { %3172 = vmatpush3.bf16.msra.mxu1 %v3169_v10 }
  0xd6   : > { %3174 = vmatprep.subr.bf16.mxu1 %v3173_v12 }
  0xd7   : > { %2799 = vmatpush3.bf16.msra.mxu0 %v3500_v52  ;;  %v3225_v52 = vpack.c.bf16 %v1330_v51, %v1329_v50 }
  0xd8   : > { %2800 = vmatprep.subr.bf16.mxu0 %v3501_v53 }
  0xd9   : > { %3176 = vmatpush3.bf16.msra.mxu1 %v3173_v12 }
  0xda   : > { %3178 = vmatprep.subr.bf16.mxu1 %v3177_v15 }
  0xdb   : > { %2801 = vmatpush3.bf16.msra.mxu0 %v3502_v54  ;;  %v2616_v54 = vld [vmem:[%s4682_s2] ss:$0 sm:$0xff] }
  0xdc   : > { %2802 = vmatprep.subr.bf16.mxu0 %v3503_v55 }
  0xdd   : > { %3180 = vmatpush3.bf16.msra.mxu1 %v3177_v15 }
  0xde   : > { %3182 = vmatprep.subr.bf16.mxu1 %v3181_v18 }
  0xdf   : > { %2803 = vmatpush3.bf16.msra.mxu0 %v3504_v58 }
  0xe0   : > { %2804 = vmatprep.subr.bf16.mxu0 %v3505_v59 }
  0xe1   : > { %3184 = vmatpush3.bf16.msra.mxu1 %v3181_v18 }
  0xe2   : > { %3186 = vmatprep.subr.bf16.mxu1 %v3185_v21 }
  0xe3   : > { %2805 = vmatpush3.bf16.msra.mxu0 %v3506_v1 }
  0xe4   : > { %2806 = vmatprep.subr.bf16.mxu0 %v3507_v2 }
  0xe5   : > { %3188 = vmatpush3.bf16.msra.mxu1 %v3185_v21 }
  0xe6   : > { %3190 = vmatprep.subr.bf16.mxu1 %v3189_v24 }
  0xe7   : > { %2807 = vmatpush3.bf16.msra.mxu0 %v3508_v3 }
  0xe8   : > { %3202 = vmatprep.subr.bf16.mxu0 %v3201_v34 }
  0xe9   : > { %3192 = vmatpush3.bf16.msra.mxu1 %v3189_v24  ;;  %v3229_v24 = vpack.c.bf16 %v1332_v23, %v1331_v22  ;;  %v1530_v22 = vld [vmem:[#allocation7 + $0x78] sm:$0xff] }
  0xea   : > { %1166 = vmatmul.mubr.bf16.vlgmr.msra.gmra.mrb[4].mxu0 %v645_v6  ;;  %3194 = vmatprep.subr.bf16.mxu1 %v3193_v27 }
  0xeb   : > { %3204 = vmatpush3.bf16.msra.mxu0 %v3201_v34  ;;  %v1423_v34 = vld [vmem:[%s4687_s7 + $0x30] sm:$0xff] }
  0xec   : > { %3206 = vmatprep.subr.bf16.mxu0 %v3205_v36 }
  0xed   : > { %3196 = vmatpush3.bf16.msra.mxu1 %v3193_v27  ;;  %v1419_v27 = vld [vmem:[%s4687_s7 + $0x10] sm:$0xff] }
  0xee   : > { %3198 = vmatprep.subr.bf16.mxu1 %v3197_v30 }
  0xef   : > { %3208 = vmatpush3.bf16.msra.mxu0 %v3205_v36  ;;  %v3245_v36 = vpack.c.bf16 %v1424_v35, %v1423_v34  ;;  %v1622_v34 = vld [vmem:[#allocation8 + $0x38] sm:$0xff] }
  0xf0   : > { %3210 = vmatprep.subr.bf16.mxu0 %v3209_v39 }
  0xf1   : > { %3200 = vmatpush3.bf16.msra.mxu1 %v3197_v30  ;;  %v3237_v30 = vpack.c.bf16 %v1420_v29, %v1419_v27 }
  0xf2   : > { %3234 = vmatprep.subr.bf16.mxu1 %v3233_v28 }
  0xf3   : > { %3212 = vmatpush3.bf16.msra.mxu0 %v3209_v39  ;;  %v3249_v39 = vpack.c.bf16 %v1426_v38, %v1425_v37  ;;  %v1624_v37 = vld [vmem:[#allocation8 + $0x48] sm:$0xff] }
  0xf4   : > { %3214 = vmatprep.subr.bf16.mxu0 %v3213_v42 }
  0xf7   : > { %3216 = vmatpush3.bf16.msra.mxu0 %v3213_v42  ;;  %v3253_v42 = vpack.c.bf16 %v1428_v41, %v1427_v40  ;;  %v1626_v40 = vld [vmem:[#allocation8 + $0x58] sm:$0xff] }
  0xf8   : > { %3218 = vmatprep.subr.bf16.mxu0 %v3217_v46 }
  0xfb   : > { %3220 = vmatpush3.bf16.msra.mxu0 %v3217_v46  ;;  %v3257_v46 = vpack.c.bf16 %v1430_v45, %v1429_v44  ;;  %v1628_v44 = vld [vmem:[#allocation8 + $0x68] sm:$0xff] }
  0xfc   : > { %3222 = vmatprep.subr.bf16.mxu0 %v3221_v49 }
  0xff   : > { %3224 = vmatpush3.bf16.msra.mxu0 %v3221_v49 }
 0x100   : > { %3226 = vmatprep.subr.bf16.mxu0 %v3225_v52 }
 0x103   : > { %3228 = vmatpush3.bf16.msra.mxu0 %v3225_v52 }
 0x104   : > { %3230 = vmatprep.subr.bf16.mxu0 %v3229_v24 }
 0x107   : > { %3232 = vmatpush3.bf16.msra.mxu0 %v3229_v24  ;;  %v1615_v24 = vld [vmem:[#allocation8] sm:$0xff] }
 0x108   : > { %v3297_v27 = vpack.c.bf16 %v1616_v25, %v1615_v24  ;;  %v3518_v24 = vld [vmem:[%s4695_s15 + $0x3c] ss:$28 sps:$4 sm:$0xff]  }
 0x109   : > { %v3516_v25 = vld [vmem:[%s4695_s15 + $0x38] ss:$28 sps:$4 sm:$0xff]  }
 0x19d   : > { %v2764_v53 = vpop.f32.mrb[0].mxu0 }
 0x19e   : > { %v2765_v55 = vpop.f32.mrb[1].mxu0 }
 0x19f   : > { %v2766_v56 = vadd.f32 %v2765_v55, %v2764_v53  ;;  %v2767_v57 = vpop.f32.mrb[2].mxu0  ;;  %v2786_v58 = vpop.f32.mrb[0].mxu1  ;;  %v1432_v55 = vld [vmem:[%s4687_s7 + $0x78] sm:$0xff] }
 0x1a0   : > { %v2768_v59 = vpop.f32.mrb[3].mxu0  ;;  %v2787_v62 = vpop.f32.mrb[1].mxu1 }
 0x1a1   : > { %v1086_v60 = vadd.f32 %v2766_v56, %v2616_v54  ;;  %v2769_v61 = vadd.f32 %v2768_v59, %v2767_v57  ;;  %v2788_v63 = vadd.f32 %v2787_v62, %v2786_v58  ;;  %v2789_v0 = vpop.f32.mrb[2].mxu1  ;;  %v1515_v57 = vld [vmem:[#allocation7] sm:$0xff]  ;;  %v1516_v58 = vld [vmem:[#allocation7 + $0x8] sm:$0xff]  ;;  %v1517_v59 = vld [vmem:[#allocation7 + $0x10] sm:$0xff] }
 0x1a2   : > { %v2790_v2 = vpop.f32.mrb[3].mxu1 }
 0x1a3   : > { %v1089_v1 = vadd.f32 %v2769_v61, %v2616_v54  ;;  %v1127_v3 = vadd.f32 %v2788_v63, %v1086_v60  ;;  %v2791_v4 = vadd.f32 %v2790_v2, %v2789_v0  ;;  %v1431_v54 = vld [vmem:[%s4687_s7 + $0x70] sm:$0xff]  ;;  %v3265_v60 = vpack.c.bf16 %v1516_v58, %v1515_v57  ;;  %v1518_v61 = vld [vmem:[#allocation7 + $0x18] sm:$0xff]  ;;  %v1519_v63 = vld [vmem:[#allocation7 + $0x20] sm:$0xff] }
 0x1a4   : > { %v3261_v56 = vpack.c.bf16 %v1432_v55, %v1431_v54  ;;  %v3269_v62 = vpack.c.bf16 %v1518_v61, %v1517_v59  ;;  %v1520_v0 = vld [vmem:[#allocation7 + $0x28] sm:$0xff]  ;;  %v1521_v2 = vld [vmem:[#allocation7 + $0x30] sm:$0xff]  ;;  %v1715_v54 = vld [vmem:[#allocation10] sm:$0xff] }
 0x1a5   : > { %v1130_v5 = vadd.f32 %v2791_v4, %v1089_v1  ;;  %3266 = vmatprep.subr.bf16.mxu0 %v3265_v60  ;;  %v3273_v1 = vpack.c.bf16 %v1520_v0, %v1519_v63  ;;  %v1716_v55 = vld [vmem:[#allocation10 + $0x8] sm:$0xff]  ;;  %v1718_v58 = vld [vmem:[#allocation10 + $0x18] sm:$0xff]  ;;  %v1721_v63 = vld [vmem:[#allocation10 + $0x30] sm:$0xff] }
 0x1a6   : > { %v3329_v57 = vpack.c.bf16 %v1716_v55, %v1715_v54  ;;  %v1720_v61 = vld [vmem:[#allocation10 + $0x28] sm:$0xff]  ;;  %v1722_v0 = vld [vmem:[#allocation10 + $0x38] sm:$0xff] }
 0x1a7   : > { %v1208_v6 = vpop.f32.mrb[4].mxu1  ;;  %v3543_v54 = vld [vmem:[%s4695_s15 + $0x120] ss:$28 sps:$4 sm:$0xff]  }
 0x1a8   : > { %v2937_v7 = vpop.f32.mrb[5].mxu1  ;;  %v3551_v55 = vld [vmem:[%s4695_s15 + $0x15c] ss:$28 sps:$4 sm:$0xff]  }
 0x1a9   : > { %v1211_v8 = vpop.f32.mrb[6].mxu1 }
 0x1aa   : > { %v2938_v9 = vpop.f32.mrb[7].mxu1 }
 0x1ab   : > { %v1526_v9 = vld [vmem:[#allocation7 + $0x58] sm:$0xff] }
 0x1bd   : > { %v2808_v10 = vpop.f32.mrb[4].mxu0 }
 0x1be   : > { %v2809_v11 = vpop.f32.mrb[5].mxu0 }
 0x1bf   : > { %v2810_v12 = vadd.f32 %v2809_v11, %v2808_v10  ;;  %v2811_v13 = vpop.f32.mrb[6].mxu0  ;;  %v1527_v11 = vld [vmem:[#allocation7 + $0x60] sm:$0xff] }
 0x1c0   : > { %v2812_v14 = vpop.f32.mrb[7].mxu0 }
 0x1c1   : > { %v1168_v15 = vadd.f32 %v2810_v12, %v1127_v3  ;;  %v2813_v16 = vadd.f32 %v2812_v14, %v2811_v13  ;;  %v1522_v3 = vld [vmem:[#allocation7 + $0x38] sm:$0xff]  ;;  %v1528_v12 = vld [vmem:[#allocation7 + $0x68] sm:$0xff]  ;;  %v2668_v14 = vld [vmem:[%s4686_s6] ss:$0 sm:$0xff] }
 0x1c2   : > { %v3277_v4 = vpack.c.bf16 %v1522_v3, %v1521_v2  ;;  %v3289_v13 = vpack.c.bf16 %v1528_v12, %v1527_v11  ;;  %v1723_v2 = vld [vmem:[#allocation10 + $0x40] sm:$0xff]  ;;  %v1724_v3 = vld [vmem:[#allocation10 + $0x48] sm:$0xff] }
 0x1c3   : > { %v1209_v17 = vadd.f32 %v1208_v6, %v1168_v15  ;;  %v1171_v18 = vadd.f32 %v2813_v16, %v1130_v5  ;;  %v1523_v5 = vld [vmem:[#allocation7 + $0x40] sm:$0xff]  ;;  %v1524_v6 = vld [vmem:[#allocation7 + $0x48] sm:$0xff] }
 0x1c4   : > { %v3281_v7 = vpack.c.bf16 %v1524_v6, %v1523_v5  ;;  %v1725_v5 = vld [vmem:[#allocation10 + $0x50] sm:$0xff]  ;;  %v1726_v6 = vld [vmem:[#allocation10 + $0x58] sm:$0xff]  ;;  %v2670_v11 = vld [vmem:[%s4690_s10] ss:$0 sm:$0xff] }
 0x1c5   : > { %v1215_v19 = vmax.f32 %v1209_v17, 0.0  ;;  %v1212_v20 = vadd.f32 %v1211_v8, %v1171_v18  ;;  %v1525_v8 = vld [vmem:[#allocation7 + $0x50] sm:$0xff] }
 0x1c6   : > { %v3285_v10 = vpack.c.bf16 %v1526_v9, %v1525_v8  ;;  %v1727_v8 = vld [vmem:[#allocation10 + $0x60] sm:$0xff]  ;;  %v1728_v9 = vld [vmem:[#allocation10 + $0x68] sm:$0xff] }
 0x1c7   : > { %v1216_v21 = vmax.f32 %v1212_v20, 0.0  ;;  %2971 = vmatprep.mubr.f32.mxu1 %v1215_v19 }
 0x1c9   : > { %2972 = vmatmul.mubr.f32.vlgmr.msra.gmra.mrb[8].mxu1 %v1216_v21  ;;  %v1529_v21 = vld [vmem:[#allocation7 + $0x70] sm:$0xff] }
 0x1ca   : > { %3236 = vmatpush3.bf16.msra.mxu1 %v3233_v28  ;;  %v3293_v23 = vpack.c.bf16 %v1530_v22, %v1529_v21  ;;  %v1618_v28 = vld [vmem:[#allocation8 + $0x18] sm:$0xff]  ;;  %v3512_v22 = vld [vmem:[%s4695_s15 + $0x4] ss:$28 sps:$4 sm:$0xff]  }
 0x1cb   : > { %3238 = vmatprep.subr.bf16.mxu1 %v3237_v30  ;;  %v3301_v29 = vpack.c.bf16 %v1618_v28, %v1617_v26  ;;  %v3510_v21 = vld [vmem:[%s4695_s15] ss:$28 sps:$4 sm:$0xff]   ;;  %v3524_v26 = vld [vmem:[%s4695_s15 + $0x74] ss:$28 sps:$4 sm:$0xff]   ;;  %v3530_v28 = vld [vmem:[%s4695_s15 + $0xac] ss:$28 sps:$4 sm:$0xff]  }
 0x1ce   : > { %3240 = vmatpush3.bf16.msra.mxu1 %v3237_v30  ;;  %v1619_v30 = vld [vmem:[#allocation8 + $0x20] sm:$0xff] }
 0x1cf   : > { %3242 = vmatprep.subr.bf16.mxu1 %v3241_v33  ;;  %v3305_v32 = vpack.c.bf16 %v1620_v31, %v1619_v30  ;;  %v3536_v30 = vld [vmem:[%s4695_s15 + $0xe4] ss:$28 sps:$4 sm:$0xff]  }
 0x1d0   : > { %v3534_v31 = vld [vmem:[%s4695_s15 + $0xe0] ss:$28 sps:$4 sm:$0xff]  }
 0x1d2   : > { %3244 = vmatpush3.bf16.msra.mxu1 %v3241_v33  ;;  %v1621_v33 = vld [vmem:[#allocation8 + $0x30] sm:$0xff] }
 0x1d3   : > { %3246 = vmatprep.subr.bf16.mxu1 %v3245_v36  ;;  %v3309_v35 = vpack.c.bf16 %v1622_v34, %v1621_v33  ;;  %v3540_v33 = vld [vmem:[%s4695_s15 + $0x118] ss:$28 sps:$4 sm:$0xff]  }
 0x1d4   : > { %v3548_v34 = vld [vmem:[%s4695_s15 + $0x154] ss:$28 sps:$4 sm:$0xff]  }
 0x1d6   : > { %3248 = vmatpush3.bf16.msra.mxu1 %v3245_v36  ;;  %v1623_v36 = vld [vmem:[#allocation8 + $0x40] sm:$0xff] }
 0x1d7   : > { %3250 = vmatprep.subr.bf16.mxu1 %v3249_v39  ;;  %v3313_v38 = vpack.c.bf16 %v1624_v37, %v1623_v36  ;;  %v2671_v36 = vld [vmem:[%s4692_s12] ss:$0 sm:$0xff] }
 0x1da   : > { %3252 = vmatpush3.bf16.msra.mxu1 %v3249_v39  ;;  %v1625_v39 = vld [vmem:[#allocation8 + $0x50] sm:$0xff] }
 0x1db   : > { %3254 = vmatprep.subr.bf16.mxu1 %v3253_v42  ;;  %v3317_v41 = vpack.c.bf16 %v1626_v40, %v1625_v39 }
 0x1de   : > { %3256 = vmatpush3.bf16.msra.mxu1 %v3253_v42  ;;  %v1627_v42 = vld [vmem:[#allocation8 + $0x60] sm:$0xff] }
 0x1df   : > { %3258 = vmatprep.subr.bf16.mxu1 %v3257_v46  ;;  %v3321_v45 = vpack.c.bf16 %v1628_v44, %v1627_v42  ;;  %v3513_v42 = vld [vmem:[%s4695_s15 + $0x8] ss:$28 sps:$4 sm:$0xff]  }
 0x1e2   : > { %3260 = vmatpush3.bf16.msra.mxu1 %v3257_v46  ;;  %v2669_v46 = vld [vmem:[%s4688_s8] ss:$0 sm:$0xff] }
 0x1e3   : > { %3262 = vmatprep.subr.bf16.mxu1 %v3261_v56 }
 0x1e6   : > { %3264 = vmatpush3.bf16.msra.mxu1 %v3261_v56  ;;  %v1717_v56 = vld [vmem:[#allocation10 + $0x10] sm:$0xff] }
 0x1e7   : > { %3298 = vmatprep.subr.bf16.mxu1 %v3297_v27  ;;  %v3333_v59 = vpack.c.bf16 %v1718_v58, %v1717_v56  ;;  %v3549_v56 = vld [vmem:[%s4695_s15 + $0x158] ss:$28 sps:$4 sm:$0xff]  }
 0x1e8   : > { %v3557_v58 = vld [vmem:[%s4695_s15 + $0x194] ss:$28 sps:$4 sm:$0xff]  }
 0x29c   : > { %v2973_v48 = vpop.f32.mrb[8].mxu1 }
 0x29d   : > { %v1312_v49 = vadd.f32 %v2973_v48, %v2667_v47  ;;  %v1306_v50 = vpop.f32.mrb[9].mxu1 }
 0x29e   : > { %v1307_v51 = vadd.f32 %v2667_v47, %v1306_v50 }
 0x29f   : > { %v1316_v53 = vmax.f32 %v1312_v49, 0.0 }
 0x2a0   : > { %v1315_v52 = vmax.f32 %v1307_v51, 0.0  ;;  %v1629_v51 = vld [vmem:[#allocation8 + $0x70] sm:$0xff] }
 0x2a2   : > { %3006 = vmatprep.mubr.f32.mxu0 %v1315_v52  ;;  %v1630_v52 = vld [vmem:[#allocation8 + $0x78] sm:$0xff] }
 0x2a3   : > { %3007 = vmatmul.mubr.f32.vlgmr.msra.gmra.mrb[8].mxu0 %v1316_v53  ;;  %v3325_v53 = vpack.c.bf16 %v1630_v52, %v1629_v51  ;;  %v3539_v51 = vld [vmem:[%s4695_s15 + $0xec] ss:$28 sps:$4 sm:$0xff]  }
 0x2a4   : > { %3268 = vmatpush3.bf16.msra.mxu0 %v3265_v60  ;;  %v1719_v60 = vld [vmem:[#allocation10 + $0x20] sm:$0xff] }
 0x2a5   : > { %3270 = vmatprep.subr.bf16.mxu0 %v3269_v62  ;;  %v3537_v52 = vld [vmem:[%s4695_s15 + $0xe8] ss:$28 sps:$4 sm:$0xff]  }
 0x2a8   : > { %3272 = vmatpush3.bf16.msra.mxu0 %v3269_v62  ;;  %v3337_v62 = vpack.c.bf16 %v1720_v61, %v1719_v60  ;;  %v3555_v60 = vld [vmem:[%s4695_s15 + $0x190] ss:$28 sps:$4 sm:$0xff]  }
 0x2a9   : > { %3274 = vmatprep.subr.bf16.mxu0 %v3273_v1  ;;  %v3560_v61 = vld [vmem:[%s4695_s15 + $0x14] ss:$28 sps:$4 sm:$0xff]  }
 0x2ac   : > { %3276 = vmatpush3.bf16.msra.mxu0 %v3273_v1  ;;  %v3341_v1 = vpack.c.bf16 %v1722_v0, %v1721_v63  ;;  %v2672_v63 = vld [vmem:[%s4742_s25] ss:$0 sm:$0xff]  ;;  %s615_s25 = sand.u32 1, %s4744_s18  }
 0x2ad   : > { %3278 = vmatprep.subr.bf16.mxu0 %v3277_v4  ;;  %s3361_s26 = smul.u32 112, %s615_s25  ;;  %s4639_s28 = scalar_lea.sflag [#allocation4], %s615_s25 }
 0x2af   : > { %s4607_s17 = scalar_lea.vmem [#allocation11], %s3361_s26 }
 0x2b0   : > { %3280 = vmatpush3.bf16.msra.mxu0 %v3277_v4  ;;  %v3345_v4 = vpack.c.bf16 %v1724_v3, %v1723_v2  ;;  %s2488_s24 = sshll.u32 %s4607_s17, 4  ;;  %s4632_s24 = int_to_ptr.vmem [resolvable:$true] %s2488_s24 }
 0x2b1   : > { %3282 = vmatprep.subr.bf16.mxu0 %v3281_v7  ;;  %s3786_s16 = scalar_lea.vmem %s4632_s24, 1792  ;;  %p3793_p6 = scmp.lt.s32.totalorder %s4632_s24, %s3791_s22 }
 0x2b2   : > { %p3787_p8 = scmp.ne.s32.totalorder %s4632_s24, %s3786_s16  ;;  %p3794_p9 = scmp.lt.s32.totalorder %s3792_s19, %s3786_s16 }
 0x2b4   : > { %3284 = vmatpush3.bf16.msra.mxu0 %v3281_v7  ;;  %v3349_v7 = vpack.c.bf16 %v1726_v6, %v1725_v5  ;;  %v3558_v6 = vld [vmem:[%s4695_s15 + $0x10] ss:$28 sps:$4 sm:$0xff]   ;;  %p3788_p13 = pnand %p3787_p8, %p4747_p11  ;;  %p3795_p5 = por %p3794_p9, %p3793_p6 }
 0x2b5   : > { %3286 = vmatprep.subr.bf16.mxu0 %v3285_v10 }
 0x2b6   : > { %p3789_p1 = pneg %p3788_p13 }
 0x2b8   : > { %3288 = vmatpush3.bf16.msra.mxu0 %v3285_v10  ;;  %v3353_v10 = vpack.c.bf16 %v1728_v9, %v1727_v8  ;;  %v3564_v9 = vld [vmem:[%s4695_s15 + $0x4c] ss:$28 sps:$4 sm:$0xff]   ;;  %p3796_p0 = pnand %p3795_p5, %p3789_p1 }
 0x2b9   : > { %3290 = vmatprep.subr.bf16.mxu0 %v3289_v13 }
 0x2bc   : > { %3292 = vmatpush3.bf16.msra.mxu0 %v3289_v13 }
 0x2bd   : > { %3294 = vmatprep.subr.bf16.mxu0 %v3293_v23 }
 0x2c0   : > { %3296 = vmatpush3.bf16.msra.mxu0 %v3293_v23  ;;  %v3515_v23 = vld [vmem:[%s4695_s15 + $0xc] ss:$28 sps:$4 sm:$0xff]  }
 0x2c1   : > { %3330 = vmatprep.subr.bf16.mxu0 %v3329_v57 }
 0x376   : > { %v3008_v15 = vpop.f32.mrb[8].mxu0 }
 0x377   : > { %v1412_v16 = vadd.f32 %v3008_v15, %v2668_v14  ;;  %v1406_v17 = vpop.f32.mrb[9].mxu0 }
 0x378   : > { %v1407_v18 = vadd.f32 %v2668_v14, %v1406_v17 }
 0x379   : > { %v1416_v20 = vmax.f32 %v1412_v16, 0.0 }
 0x37a   : > { %v1415_v19 = vmax.f32 %v1407_v18, 0.0  ;;  %v1729_v18 = vld [vmem:[#allocation10 + $0x70] sm:$0xff] }
 0x37c   : > { %3041 = vmatprep.mubr.f32.mxu1 %v1415_v19  ;;  %v1730_v19 = vld [vmem:[#allocation10 + $0x78] sm:$0xff] }
 0x37d   : > { %3042 = vmatmul.mubr.f32.vlgmr.msra.gmra.mrb[10].mxu1 %v1416_v20  ;;  %v3357_v20 = vpack.c.bf16 %v1730_v19, %v1729_v18  ;;  %v3576_v18 = vld [vmem:[%s4695_s15 + $0xf4] ss:$28 sps:$4 sm:$0xff]  }
 0x37e   : > { %3300 = vmatpush3.bf16.msra.mxu1 %v3297_v27  ;;  %v3522_v27 = vld [vmem:[%s4695_s15 + $0x70] ss:$28 sps:$4 sm:$0xff]  }
 0x37f   : > { %3302 = vmatprep.subr.bf16.mxu1 %v3301_v29  ;;  %v3574_v19 = vld [vmem:[%s4695_s15 + $0xf0] ss:$28 sps:$4 sm:$0xff]  }
 0x382   : > { %3304 = vmatpush3.bf16.msra.mxu1 %v3301_v29  ;;  %v3528_v29 = vld [vmem:[%s4695_s15 + $0xa8] ss:$28 sps:$4 sm:$0xff]  }
 0x383   : > { %3306 = vmatprep.subr.bf16.mxu1 %v3305_v32 }
 0x386   : > { %3308 = vmatpush3.bf16.msra.mxu1 %v3305_v32  ;;  %v3542_v32 = vld [vmem:[%s4695_s15 + $0x11c] ss:$28 sps:$4 sm:$0xff]  }
 0x387   : > { %3310 = vmatprep.subr.bf16.mxu1 %v3309_v35 }
 0x38a   : > { %3312 = vmatpush3.bf16.msra.mxu1 %v3309_v35  ;;  %v3546_v35 = vld [vmem:[%s4695_s15 + $0x150] ss:$28 sps:$4 sm:$0xff]  }
 0x38b   : > { %3314 = vmatprep.subr.bf16.mxu1 %v3313_v38 }
 0x38e   : > { %3316 = vmatpush3.bf16.msra.mxu1 %v3313_v38 }
 0x38f   : > { %3318 = vmatprep.subr.bf16.mxu1 %v3317_v41 }
 0x392   : > { %3320 = vmatpush3.bf16.msra.mxu1 %v3317_v41 }
 0x393   : > { %3322 = vmatprep.subr.bf16.mxu1 %v3321_v45 }
 0x396   : > { %3324 = vmatpush3.bf16.msra.mxu1 %v3321_v45  ;;  %v3521_v45 = vld [vmem:[%s4695_s15 + $0x44] ss:$28 sps:$4 sm:$0xff]  }
 0x397   : > { %3326 = vmatprep.subr.bf16.mxu1 %v3325_v53 }
 0x39a   : > { %3328 = vmatpush3.bf16.msra.mxu1 %v3325_v53  ;;  %v3545_v53 = vld [vmem:[%s4695_s15 + $0x124] ss:$28 sps:$4 sm:$0xff]  }
 0x39b   : > { %2205 = vmatprep.subr.bf16.mxu1 %v3512_v22  ;;  %v3578_v22 = vld [vmem:[%s4695_s15 + $0x128] ss:$28 sps:$4 sm:$0xff]  }
 0x450   : > { %v3043_v47 = vpop.f32.mrb[10].mxu1 }
 0x451   : > { %v1506_v48 = vpop.f32.mrb[11].mxu1  ;;  %v1512_v50 = vadd.f32 %v3043_v47, %v2669_v46  ;;  %v3527_v47 = vld [vmem:[%s4695_s15 + $0x7c] ss:$28 sps:$4 sm:$0xff]  }
 0x452   : > { %v1507_v49 = vadd.f32 %v2669_v46, %v1506_v48  ;;  %v3519_v46 = vld [vmem:[%s4695_s15 + $0x40] ss:$28 sps:$4 sm:$0xff]   ;;  %v3525_v48 = vld [vmem:[%s4695_s15 + $0x78] ss:$28 sps:$4 sm:$0xff]  }
 0x454   : > { %3076 = vmatprep.mubr.f32.mxu0 %v1507_v49  ;;  %v3533_v49 = vld [vmem:[%s4695_s15 + $0xb4] ss:$28 sps:$4 sm:$0xff]  }
 0x455   : > { %3077 = vmatmul.mubr.f32.vlgmr.msra.gmra.mrb[10].mxu0 %v1512_v50  ;;  %v3531_v50 = vld [vmem:[%s4695_s15 + $0xb0] ss:$28 sps:$4 sm:$0xff]  }
 0x456   : > { %3332 = vmatpush3.bf16.msra.mxu0 %v3329_v57  ;;  %v3554_v57 = vld [vmem:[%s4695_s15 + $0x18c] ss:$28 sps:$4 sm:$0xff]  }
 0x457   : > { %3334 = vmatprep.subr.bf16.mxu0 %v3333_v59 }
 0x45a   : > { %3336 = vmatpush3.bf16.msra.mxu0 %v3333_v59  ;;  %v3552_v59 = vld [vmem:[%s4695_s15 + $0x188] ss:$28 sps:$4 sm:$0xff]  }
 0x45b   : > { %3338 = vmatprep.subr.bf16.mxu0 %v3337_v62 }
 0x45e   : > { %3340 = vmatpush3.bf16.msra.mxu0 %v3337_v62  ;;  %v3871_v62 = vmov 0  }
 0x45f   : > { %3342 = vmatprep.subr.bf16.mxu0 %v3341_v1 }
 0x462   : > { %3344 = vmatpush3.bf16.msra.mxu0 %v3341_v1 }
 0x463   : > { %3346 = vmatprep.subr.bf16.mxu0 %v3345_v4 }
 0x466   : > { %3348 = vmatpush3.bf16.msra.mxu0 %v3345_v4 }
 0x467   : > { %3350 = vmatprep.subr.bf16.mxu0 %v3349_v7 }
 0x46a   : > { %3352 = vmatpush3.bf16.msra.mxu0 %v3349_v7  ;;  %v3561_v7 = vld [vmem:[%s4695_s15 + $0x18] ss:$28 sps:$4 sm:$0xff]  }
 0x46b   : > { %3354 = vmatprep.subr.bf16.mxu0 %v3353_v10 }
 0x46e   : > { %3356 = vmatpush3.bf16.msra.mxu0 %v3353_v10  ;;  %v3562_v10 = vld [vmem:[%s4695_s15 + $0x48] ss:$28 sps:$4 sm:$0xff]  }
 0x46f   : > { %3358 = vmatprep.subr.bf16.mxu0 %v3357_v20 }
 0x472   : > { %3360 = vmatpush3.bf16.msra.mxu0 %v3357_v20  ;;  %v3577_v20 = vld [vmem:[%s4695_s15 + $0xf8] ss:$28 sps:$4 sm:$0xff]  }
 0x473   : > { %2248 = vmatprep.subr.bf16.mxu0 %v3515_v23  ;;  %v3581_v23 = vld [vmem:[%s4695_s15 + $0x130] ss:$28 sps:$4 sm:$0xff]  }
 0x528   : > { %v3078_v12 = vpop.f32.mrb[10].mxu0 }
 0x529   : > { %v1610_v13 = vadd.f32 %v3078_v12, %v2670_v11  ;;  %v1604_v14 = vpop.f32.mrb[11].mxu0  ;;  %v3568_v12 = vld [vmem:[%s4695_s15 + $0x84] ss:$28 sps:$4 sm:$0xff]  }
 0x52a   : > { %v1605_v15 = vadd.f32 %v2670_v11, %v1604_v14  ;;  %v3565_v11 = vld [vmem:[%s4695_s15 + $0x50] ss:$28 sps:$4 sm:$0xff]   ;;  %v3569_v14 = vld [vmem:[%s4695_s15 + $0x88] ss:$28 sps:$4 sm:$0xff]  }
 0x52b   : > { %v1614_v17 = vmax.f32 %v1610_v13, 0.0  ;;  %v3566_v13 = vld [vmem:[%s4695_s15 + $0x80] ss:$28 sps:$4 sm:$0xff]  }
 0x52c   : > { %v1613_v16 = vmax.f32 %v1605_v15, 0.0  ;;  %v3572_v15 = vld [vmem:[%s4695_s15 + $0xbc] ss:$28 sps:$4 sm:$0xff]  }
 0x52e   : > { %3111 = vmatprep.mubr.f32.mxu1 %v1613_v16  ;;  %v3570_v16 = vld [vmem:[%s4695_s15 + $0xb8] ss:$28 sps:$4 sm:$0xff]  }
 0x52f   : > { %3112 = vmatmul.mubr.f32.vlgmr.msra.gmra.mrb[12].mxu1 %v1614_v17  ;;  %v3573_v17 = vld [vmem:[%s4695_s15 + $0xc0] ss:$28 sps:$4 sm:$0xff]  }
 0x530   : > { %2206 = vmatpush1.bf16.msra.mxu1 %v3510_v21  ;;  %2237 = vmatprep.mubr.bf16.mxu1 %v3871_v62  ;;  %v3580_v21 = vld [vmem:[%s4695_s15 + $0x12c] ss:$28 sps:$4 sm:$0xff]  }
 0x531   : > { %2207 = vmatprep.subr.bf16.mxu1 %v3518_v24  ;;  %v3584_v24 = vld [vmem:[%s4695_s15 + $0x164] ss:$28 sps:$4 sm:$0xff]  }
 0x534   : > { %2208 = vmatpush1.bf16.msra.mxu1 %v3516_v25  ;;  %v3582_v25 = vld [vmem:[%s4695_s15 + $0x160] ss:$28 sps:$4 sm:$0xff]  }
 0x535   : > { %2209 = vmatprep.subr.bf16.mxu1 %v3524_v26  ;;  %v3585_v26 = vld [vmem:[%s4695_s15 + $0x168] ss:$28 sps:$4 sm:$0xff]  }
 0x538   : > { %2210 = vmatpush1.bf16.msra.mxu1 %v3522_v27  ;;  %v3588_v27 = vld [vmem:[%s4695_s15 + $0x19c] ss:$28 sps:$4 sm:$0xff]  }
 0x539   : > { %2211 = vmatprep.subr.bf16.mxu1 %v3530_v28  ;;  %v3586_v28 = vld [vmem:[%s4695_s15 + $0x198] ss:$28 sps:$4 sm:$0xff]  }
 0x53c   : > { %2212 = vmatpush1.bf16.msra.mxu1 %v3528_v29  ;;  %v3589_v29 = vld [vmem:[%s4695_s15 + $0x1a0] ss:$28 sps:$4 sm:$0xff]  }
 0x53d   : > { %2213 = vmatprep.subr.bf16.mxu1 %v3536_v30  ;;  %v1882_v30 = vlaneseq }
 0x540   : > { %2214 = vmatpush1.bf16.msra.mxu1 %v3534_v31  ;;  %v4586_v31 = vshrl.u32 %v1882_v30, 7 }
 0x541   : > { %2215 = vmatprep.subr.bf16.mxu1 %v3542_v32 }
 0x542   : > { %v1884_v32 = vsub.s32 0, %v4586_v31 }
 0x544   : > { %2216 = vmatpush1.bf16.msra.mxu1 %v3540_v33  ;;  %v1892_v33 = vsub.s32 2, %v4586_v31 }
 0x545   : > { %2217 = vmatprep.subr.bf16.mxu1 %v3548_v34  ;;  %v4593_v34 = vld [vmem:[%s4743_s27] sm:$0x7f] }
 0x548   : > { %2218 = vmatpush1.bf16.msra.mxu1 %v3546_v35  ;;  %v1888_v35 = vsub.s32 1, %v4586_v31 }
 0x549   : > { %2219 = vmatprep.subr.bf16.mxu1 %v3554_v57 }
 0x54c   : > { %2220 = vmatpush1.bf16.msra.mxu1 %v3552_v59 }
 0x54d   : > { %2291 = vmatprep.subr.bf16.mxu1 %v3560_v61 }
 0x602   : > { %v3113_v37 = vpop.f32.mrb[12].mxu1 }
 0x603   : > { %v1710_v38 = vadd.f32 %v3113_v37, %v2671_v36  ;;  %v1704_v39 = vpop.f32.mrb[13].mxu1  ;;  %v1893_v37 = vrot.slane %v4593_v34, %v1892_v33 }
 0x604   : > { %v1705_v40 = vadd.f32 %v2671_v36, %v1704_v39  ;;  %v1885_v36 = vrot.slane %v4593_v34, %v1884_v32 }
 0x605   : > { %v1714_v44 = vmax.f32 %v1710_v38, 0.0  ;;  %v1889_v38 = vrot.slane %v4593_v34, %v1888_v35 }
 0x606   : > { %v1713_v41 = vmax.f32 %v1705_v40, 0.0 }
 0x608   : > { %3146 = vmatprep.mubr.f32.mxu0 %v1713_v41 }
 0x609   : > { %3147 = vmatmul.mubr.f32.vlgmr.msra.gmra.mrb[12].mxu0 %v1714_v44 }
 0x60a   : > { %2249 = vmatpush1.bf16.msra.mxu0 %v3513_v42  ;;  %2280 = vmatprep.mubr.bf16.mxu0 %v3871_v62 }
 0x60b   : > { %2250 = vmatprep.subr.bf16.mxu0 %v3521_v45 }
 0x60e   : > { %2251 = vmatpush1.bf16.msra.mxu0 %v3519_v46 }
 0x60f   : > { %2252 = vmatprep.subr.bf16.mxu0 %v3527_v47 }
 0x612   : > { %2253 = vmatpush1.bf16.msra.mxu0 %v3525_v48 }
 0x613   : > { %2254 = vmatprep.subr.bf16.mxu0 %v3533_v49 }
 0x616   : > { %2255 = vmatpush1.bf16.msra.mxu0 %v3531_v50 }
 0x617   : > { %2256 = vmatprep.subr.bf16.mxu0 %v3539_v51 }
 0x61a   : > { %2257 = vmatpush1.bf16.msra.mxu0 %v3537_v52 }
 0x61b   : > { %2258 = vmatprep.subr.bf16.mxu0 %v3545_v53 }
 0x61e   : > { %2259 = vmatpush1.bf16.msra.mxu0 %v3543_v54 }
 0x61f   : > { %2260 = vmatprep.subr.bf16.mxu0 %v3551_v55 }
 0x622   : > { %2261 = vmatpush1.bf16.msra.mxu0 %v3549_v56 }
 0x623   : > { %2262 = vmatprep.subr.bf16.mxu0 %v3557_v58 }
 0x626   : > { %2263 = vmatpush1.bf16.msra.mxu0 %v3555_v60 }
 0x627   : > { %3149 = vmatprep.subr.bf16.mxu0 %v3869_v43 }
 0x6dc   : > { %v3148_v0 = vpop.f32.mrb[12].mxu0 }
 0x6dd   : > { %v1810_v1 = vadd.f32 %v3148_v0, %v2672_v63  ;;  %v1804_v2 = vpop.f32.mrb[13].mxu0 }
 0x6de   : > { %v1805_v3 = vadd.f32 %v2672_v63, %v1804_v2 }
 0x6df   : > { %v1814_v4 = vmax.f32 %v1810_v1, 0.0 }
 0x6e0   : > { %v1813_v5 = vmax.f32 %v1805_v3, 0.0 }
 0x6e2   : > { %v1815_v8 = vpack.c.bf16 %v1814_v4, %v1813_v5 }
 0x6e4   : > { %2238 = vmatmul.mubr.bf16.vlgmr.msra.gmra.mrb[16].mxu1 %v1815_v8  ;;  %2281 = vmatmul.mubr.bf16.vlgmr.msra.gmra.mrb[16].mxu0 %v1815_v8 }
 0x6e5   : > { %2292 = vmatpush1.bf16.msra.mxu1 %v3558_v6  ;;  %3150 = vmatpush3.bf16.msra.mxu0 %v3561_v7 }
 0x6e6   : > { %2293 = vmatprep.subr.bf16.mxu1 %v3564_v9  ;;  %3151 = vmatprep.subr.bf16.mxu0 %v3869_v43 }
 0x6e7   : > { %2323 = vmatprep.mubr.bf16.mxu1 %v3871_v62  ;;  %3165 = vmatprep.mubr.msk.bf16.mxu0 %vm3870_vm0, %v3869_v43 }
 0x6e9   : > { %2294 = vmatpush1.bf16.msra.mxu1 %v3562_v10  ;;  %3152 = vmatpush3.bf16.msra.mxu0 %v3565_v11 }
 0x6ea   : > { %2295 = vmatprep.subr.bf16.mxu1 %v3568_v12  ;;  %3153 = vmatprep.subr.bf16.mxu0 %v3869_v43 }
 0x6ed   : > { %2296 = vmatpush1.bf16.msra.mxu1 %v3566_v13  ;;  %3154 = vmatpush3.bf16.msra.mxu0 %v3569_v14 }
 0x6ee   : > { %2297 = vmatprep.subr.bf16.mxu1 %v3572_v15  ;;  %3155 = vmatprep.subr.bf16.mxu0 %v3869_v43 }
 0x6f1   : > { %2298 = vmatpush1.bf16.msra.mxu1 %v3570_v16  ;;  %3156 = vmatpush3.bf16.msra.mxu0 %v3573_v17  ;;  %v1900_v17 = vsub.s32 4, %v4586_v31 }
 0x6f2   : > { %2299 = vmatprep.subr.bf16.mxu1 %v3576_v18  ;;  %3157 = vmatprep.subr.bf16.mxu0 %v3869_v43  ;;  %v1908_v18 = vsub.s32 6, %v4586_v31 }
 0x6f5   : > { %2300 = vmatpush1.bf16.msra.mxu1 %v3574_v19  ;;  %3158 = vmatpush3.bf16.msra.mxu0 %v3577_v20  ;;  %v1904_v19 = vsub.s32 5, %v4586_v31 }
 0x6f6   : > { %2301 = vmatprep.subr.bf16.mxu1 %v3580_v21  ;;  %3159 = vmatprep.subr.bf16.mxu0 %v3869_v43 }
 0x6f9   : > { %2302 = vmatpush1.bf16.msra.mxu1 %v3578_v22  ;;  %3160 = vmatpush3.bf16.msra.mxu0 %v3581_v23  ;;  %v1901_v22 = vrot.slane %v4593_v34, %v1900_v17  ;;  %v1909_v23 = vrot.slane %v4593_v34, %v1908_v18 }
 0x6fa   : > { %2303 = vmatprep.subr.bf16.mxu1 %v3584_v24  ;;  %3161 = vmatprep.subr.bf16.mxu0 %v3869_v43 }
 0x6fd   : > { %2304 = vmatpush1.bf16.msra.mxu1 %v3582_v25  ;;  %3162 = vmatpush3.bf16.msra.mxu0 %v3585_v26  ;;  %v1905_v25 = vrot.slane %v4593_v34, %v1904_v19 }
 0x6fe   : > { %2305 = vmatprep.subr.bf16.mxu1 %v3588_v27  ;;  %3163 = vmatprep.subr.bf16.mxu0 %v3869_v43  ;;  %v1896_v43 = vsub.s32 3, %v4586_v31 }
 0x700   : > { %v1897_v39 = vrot.slane %v4593_v34, %v1896_v43 }
 0x701   : > { %2306 = vmatpush1.bf16.msra.mxu1 %v3586_v28  ;;  %3164 = vmatpush3.bf16.msra.mxu0 %v3589_v29 }
 0x704   : > { %2324 = vmatmul.mubr.bf16.vlgmr.msra.gmra.mrb[20].mxu1 %v1815_v8  ;;  %3166 = vmatmul.mubr.bf16.vlgmr.msra.gmra.mrb[20].mxu0 %v1815_v8 }
 0x7b7   : > { %v2239_v40 = vpop.f32.mrb[16].mxu1  ;;  %v2282_v41 = vpop.f32.mrb[16].mxu0 }
 0x7b8   : > { %v2240_v42 = vadd.f32 %v2239_v40, %v1885_v36  ;;  %v2283_v44 = vadd.f32 %v2282_v41, %v1893_v37  ;;  %v2241_v45 = vpop.f32.mrb[17].mxu1  ;;  %v2284_v46 = vpop.f32.mrb[17].mxu0 }
 0x7b9   : > { %v2242_v47 = vadd.f32 %v2241_v45, %v1889_v38  ;;  %v2285_v48 = vadd.f32 %v2284_v46, %v1897_v39  ;;  %v2243_v49 = vpop.f32.mrb[18].mxu1  ;;  %v2286_v50 = vpop.f32.mrb[18].mxu0 }
 0x7ba   : > { %v2729_v51 = vmul.f32 -1.442695, %v2240_v42  ;;  %v2731_v52 = vmul.f32 -1.442695, %v2283_v44  ;;  %v2244_v53 = vadd.f32 %v2243_v49, %v1885_v36  ;;  %v2287_v54 = vadd.f32 %v2286_v50, %v1893_v37  ;;  %v2245_v55 = vpop.f32.mrb[19].mxu1  ;;  %v2288_v56 = vpop.f32.mrb[19].mxu0 }
 0x7bb   : > { %v2730_v57 = vmul.f32 -1.442695, %v2242_v47  ;;  %v2732_v58 = vmul.f32 -1.442695, %v2285_v48  ;;  %v2246_v59 = vadd.f32 %v2245_v55, %v1889_v38  ;;  %v2289_v60 = vadd.f32 %v2288_v56, %v1897_v39 }
 0x7bc   : > { %3590 = vpow2.f32 %v2729_v51  ;;  %v2736_v61 = vmul.f32 -1.442695, %v2244_v53  ;;  %v2738_v62 = vmul.f32 -1.442695, %v2287_v54 }
 0x7bd   : > { %3592 = vpow2.f32 %v2731_v52  ;;  %v2737_v63 = vmul.f32 -1.442695, %v2246_v59  ;;  %v2739_v0 = vmul.f32 -1.442695, %v2289_v60 }
 0x7be   : > { %3594 = vpow2.f32 %v2730_v57 }
 0x7bf   : > { %3596 = vpow2.f32 %v2732_v58 }
 0x7c0   : > { %3598 = vpow2.f32 %v2736_v61 }
 0x7c1   : > { %3600 = vpow2.f32 %v2738_v62 }
 0x7c2   : > { %3602 = vpow2.f32 %v2737_v63 }
 0x7c3   : > { %3604 = vpow2.f32 %v2739_v0 }
 0x7c6   : > { %v3591_v1 = vpop.eup %3590 }
 0x7c7   : > { %v3593_v2 = vpop.eup %3592  ;;  %v2417_v3 = vadd.f32 1.0, %v3591_v1 }
 0x7c8   : > { %v3595_v4 = vpop.eup %3594  ;;  %v2419_v5 = vadd.f32 1.0, %v3593_v2 }
 0x7c9   : > { %v3597_v6 = vpop.eup %3596  ;;  %3606 = vrcp.f32 %v2417_v3  ;;  %v2418_v7 = vadd.f32 1.0, %v3595_v4 }
 0x7ca   : > { %v3599_v8 = vpop.eup %3598  ;;  %3608 = vrcp.f32 %v2419_v5  ;;  %v2420_v9 = vadd.f32 1.0, %v3597_v6 }
 0x7cb   : > { %v3601_v10 = vpop.eup %3600  ;;  %3610 = vrcp.f32 %v2418_v7  ;;  %v2424_v11 = vadd.f32 1.0, %v3599_v8 }
 0x7cc   : > { %v3603_v12 = vpop.eup %3602  ;;  %3612 = vrcp.f32 %v2420_v9  ;;  %v2426_v13 = vadd.f32 1.0, %v3601_v10 }
 0x7cd   : > { %v3605_v14 = vpop.eup %3604  ;;  %3614 = vrcp.f32 %v2424_v11  ;;  %v2425_v15 = vadd.f32 1.0, %v3603_v12 }
 0x7ce   : > { %3616 = vrcp.f32 %v2426_v13  ;;  %v2427_v16 = vadd.f32 1.0, %v3605_v14 }
 0x7cf   : > { %3618 = vrcp.f32 %v2425_v15 }
 0x7d0   : > { %3620 = vrcp.f32 %v2427_v16 }
 0x7d3   : > { %v3607_v20 = vpop.eup %3606 }
 0x7d4   : > { %v3609_v21 = vpop.eup %3608  ;;  %2459 = vst [vmem:[%s4607_s17] sm:$0xff] %v3607_v20 }
 0x7d5   : > { %v3611_v24 = vpop.eup %3610  ;;  %2461 = vst [vmem:[%s4607_s17 + $0x10] sm:$0xff] %v3609_v21 }
 0x7d6   : > { %v3613_v26 = vpop.eup %3612  ;;  %2460 = vst [vmem:[%s4607_s17 + $0x8] sm:$0xff] %v3611_v24 }
 0x7d7   : > { %v3615_v27 = vpop.eup %3614  ;;  %2462 = vst [vmem:[%s4607_s17 + $0x18] sm:$0xff] %v3613_v26  ;;  %v2325_v28 = vpop.f32.mrb[20].mxu1 }
 0x7d8   : > { %v2368_v29 = vpop.f32.mrb[20].mxu0  ;;  %v3617_v30 = vpop.eup %3616  ;;  %2466 = vst [vmem:[%s4607_s17 + $0x38] sm:$0xff] %v3615_v27  ;;  %v2326_v31 = vadd.f32 %v2325_v28, %v1901_v22 }
 0x7d9   : > { %v2369_v32 = vadd.f32 %v2368_v29, %v1909_v23  ;;  %v2327_v33 = vpop.f32.mrb[21].mxu1  ;;  %v3167_v35 = vpop.f32.mrb[21].mxu0  ;;  %2468 = vst [vmem:[%s4607_s17 + $0x48] sm:$0xff] %v3617_v30 }
 0x7da   : > { %v3619_v43 = vpop.eup %3618  ;;  %v2328_v36 = vadd.f32 %v2327_v33, %v1905_v25  ;;  %v2329_v37 = vpop.f32.mrb[22].mxu1  ;;  %v2733_v39 = vmul.f32 -1.442695, %v2326_v31 }
 0x7db   : > { %v2371_v38 = vpop.f32.mrb[22].mxu0  ;;  %v3621_v34 = vpop.eup %3620  ;;  %2467 = vst [vmem:[%s4607_s17 + $0x40] sm:$0xff] %v3619_v43  ;;  %v2735_v40 = vmul.f32 -1.442695, %v2369_v32  ;;  %v2330_v41 = vadd.f32 %v2329_v37, %v1901_v22 }
 0x7dc   : > { %v2372_v42 = vadd.f32 %v2371_v38, %v1909_v23  ;;  %v2331_v44 = vpop.f32.mrb[23].mxu1  ;;  %v3168_v45 = vpop.f32.mrb[23].mxu0  ;;  %2469 = vst [vmem:[%s4607_s17 + $0x50] sm:$0xff] %v3621_v34  ;;  %v2734_v46 = vmul.f32 -1.442695, %v2328_v36  ;;  %3622 = vpow2.f32 %v2733_v39 }
 0x7dd   : > { %v2332_v47 = vadd.f32 %v2331_v44, %v1905_v25  ;;  %v2740_v48 = vmul.f32 -1.442695, %v2330_v41  ;;  %3624 = vpow2.f32 %v2735_v40 }
 0x7de   : > { %v2742_v49 = vmul.f32 -1.442695, %v2372_v42  ;;  %3626 = vpow2.f32 %v2734_v46 }
 0x7df   : > { %v2741_v50 = vmul.f32 -1.442695, %v2332_v47  ;;  %3628 = vpow2.f32 %v2740_v48 }
 0x7e0   : > { %3630 = vpow2.f32 %v2742_v49 }
 0x7e1   : > { %3632 = vpow2.f32 %v2741_v50 }
 0x7e6   : > { %v3623_v51 = vpop.eup %3622 }
 0x7e7   : > { %v3625_v52 = vpop.eup %3624  ;;  %v2421_v53 = vadd.f32 1.0, %v3623_v51 }
 0x7e8   : > { %v3627_v54 = vpop.eup %3626  ;;  %v2423_v55 = vadd.f32 1.0, %v3625_v52 }
 0x7e9   : > { %v3629_v56 = vpop.eup %3628  ;;  %3634 = vrcp.f32 %v2421_v53  ;;  %v2422_v57 = vadd.f32 1.0, %v3627_v54 }
 0x7ea   : > { %v3631_v58 = vpop.eup %3630  ;;  %3636 = vrcp.f32 %v2423_v55  ;;  %v2428_v59 = vadd.f32 1.0, %v3629_v56 }
 0x7eb   : > { %v3633_v60 = vpop.eup %3632  ;;  %3638 = vrcp.f32 %v2422_v57  ;;  %v2430_v61 = vadd.f32 1.0, %v3631_v58 }
 0x7ec   : > { %3640 = vrcp.f32 %v2428_v59  ;;  %v2429_v62 = vadd.f32 1.0, %v3633_v60 }
 0x7ed   : > { %3642 = vrcp.f32 %v2430_v61 }
 0x7ee   : > { %3644 = vrcp.f32 %v2429_v62 }
 0x7f3   : > { %v3635_v63 = vpop.eup %3634 }
 0x7f4   : > { %v3637_v0 = vpop.eup %3636  ;;  %2463 = vst [vmem:[%s4607_s17 + $0x20] sm:$0xff] %v3635_v63 }
 0x7f5   : > { %v3639_v1 = vpop.eup %3638  ;;  %2465 = vst.msk [vmem:[%s4607_s17 + $0x30] sm:$0xff] %vm1047_vm1, %v3637_v0 }
 0x7f6   : > { %v3641_v2 = vpop.eup %3640  ;;  %2464 = vst [vmem:[%s4607_s17 + $0x28] sm:$0xff] %v3639_v1 }
 0x7f7   : > { %v3643_v3 = vpop.eup %3642  ;;  %2470 = vst [vmem:[%s4607_s17 + $0x58] sm:$0xff] %v3641_v2 }
 0x7f8   : > { %v3645_v4 = vpop.eup %3644  ;;  %2472 = vst.msk [vmem:[%s4607_s17 + $0x68] sm:$0xff] %vm1047_vm1, %v3643_v3 }
 0x7f9   : > { %2471 = vst [vmem:[%s4607_s17 + $0x60] sm:$0xff] %v3645_v4 }
 0x7fa   : > { %3799 = shalt.err (!%p3796_p0)
}
 0x7fb   : > { %s3800_s30 = scalar_lea.hbm %s4629_s14, 1792  ;;  %s3804_s25 = scalar_lea.hbm %s4746_s5, 5376 }
 0x7fc   : > { %p3801_p10 = scmp.ne.s32.totalorder %s4629_s14, %s3800_s30  ;;  %p3805_p4 = scmp.lt.u32.totalorder %s4629_s14, %s4746_s5 }
 0x7fd   : > { %p3806_p12 = scmp.lt.u32.totalorder %s3804_s25, %s3800_s30  ;;  %p3808_p8 = scmp.lt.u32.totalorder %s3800_s30, %s4629_s14 }
 0x7fe   : > { %p3802_p2 = pnand %p3801_p10, %p4747_p11 }
 0x7ff   : > { %p3807_p7 = por %p3806_p12, %p3805_p4 }
 0x800   : > { %p3803_p3 = pneg %p3802_p2 }
 0x801   : > { %p3809_p13 = por %p3808_p8, %p3807_p7 }
 0x803   : > { %p3810_p1 = pnand %p3809_p13, %p3803_p3 }
 0x805   : > { %3813 = shalt.err (!%p3810_p1)
}
 0x806   : > { %s3873_s21 = smov 896   ;;  %s3874_s20 = smov 56  }
 0x807   : > { %3384 = dma.vmem_to_hbm [thread:$0]  (%p4747_p11), %s4632_s24, 1792, %s4629_s14, %s4639_s28, %s3873_s21, %s3873_s21, %s3874_s20  }
 0x808 PF: > { %s4748_s23 = sld [smem:[#allocation19_spill]]  ;;  %s4749_s16 = sld [smem:[#allocation16_spill]] }
 0x809   : > { %s4750_s1 = sld [smem:[#allocation23_spill]] }
 0x80e   : > { %p3416_p6 = scmp.ge.s32.totalorder %s4748_s23, 2  ;;  %s2503_s22 = sand.u32 1, %s4749_s16  }
 0x80f   : > { %p4751_p9 = scmp.ne.s32.totalorder %s4750_s1, 0  ;;  %s2504_s19 = scalar_lea.sflag [#allocation4], %s2503_s22 }
 0x811   : > { %p3403_p5 = pnand %p3416_p6, %p4751_p9 }
 0x813   : > { %3843 = dma.done.wait (!%p3403_p5), %s2504_s19, 1792  }
 0x814   : > { %3845 = vsyncadd (!%p3403_p5), %s2504_s19, 4294965504  ;;  %s4752_s27 = sld [smem:[#allocation20_spill]]  ;;  %s4753_s24 = sld [smem:[#allocation17_spill]] }
 0x815   : > { %s4754_s25 = sld [smem:[#allocation18_spill]]  ;;  %s4755_s26 = sld [smem:[#allocation21_spill]] }
 0x81a   : > { %p30_p0 = scmp.ge.s32.totalorder %s4752_s27, 5  }
 0x81c   :  { %32 = sbr.rel (!%p30_p0) target bundleno = 13 (0xd), region = 144 }
 0x823   :  { %2509 = vsyncpa [#allocation3], 1 }
 0x824   :  { %2511 = vsyncpa [#allocation3 + $0x1], 1 }
 0x825   :  { %2512 = vsyncpa [#allocation6], 1 }
 0x826   :  { %2513 = vsyncpa [#allocation9], 1 }
 0x827   :  { %2514 = vsyncpa [#allocation4], 1 }
 0x828   :  { %2516 = vsyncpa [#allocation4 + $0x1], 1 }

</bundles_post_ra>
